<compile_context>
chip_gen: v7x
topology: tpu7x:2x2x1
jax: 0.10.0
libtpu: 0.0.40
codegen_flags: <defaults>
</compile_context>

<pallas_src>
import functools

import jax
import jax.numpy as jnp
from jax.experimental import pallas as pl
from jax.experimental.pallas import tpu as pltpu

_BN_EPS = 1e-5
_LANES = 128
_VMEM_LIMIT = 48 * 1024 * 1024  # conservative w.r.t. v7x's 64 MiB physical VMEM


def _round_up(x, m):
    return (x + m - 1) // m * m


# --------------------------------------------------------------------------
# Kernel 1: 3x3 conv (padding already applied) + per-tile BN partial stats
# --------------------------------------------------------------------------
def conv3x3_stats_kernel(xp_ref, w_ref, y_ref, sum_ref, sq_ref, *, th, w_out, cin):
    """One (n, row-tile) grid cell.

    xp_ref : (1, H+2, W+2, Cin) f32  zero-padded input image (resident per n)
    w_ref  : (9, Cin, Cp)       bf16 conv weights, tap-major (dy*3+dx)
    y_ref  : (1, TH, W, Cp)     f32  conv output tile
    sum_ref: (1, 1, 1, Cp)      f32  per-tile per-channel sum
    sq_ref : (1, 1, 1, Cp)      f32  per-tile per-channel sum of squares
    """
    cp = w_ref.shape[-1]
    h = pl.program_id(1)
    row0 = h * th
    if th % 8 == 0:
        row0 = pl.multiple_of(row0, 8)

    # 9 shifted (1, TH, W, Cin) views of the padded input, cast to bf16 for the MXU.
    taps = [
        xp_ref[:, pl.ds(row0 + dy, th), pl.ds(dx, w_out), :].astype(jnp.bfloat16)
        for dy in range(3)
        for dx in range(3)
    ]
    m = th * w_out

    if cin % _LANES == 0:
        # Lane-aligned im2col -> a single K = 9*Cin MXU matmul.
        patch = jnp.concatenate(taps, axis=-1).reshape(m, 9 * cin)
        wmat = w_ref[...].reshape(9 * cin, cp)
        acc = jnp.dot(patch, wmat, preferred_element_type=jnp.float32)
    else:
        # Tiny-Cin fallback (first layer only): accumulate 9 K=Cin matmuls in f32.
        acc = jnp.zeros((m, cp), jnp.float32)
        for t, tap in enumerate(taps):
            acc = acc + jnp.dot(tap.reshape(m, cin), w_ref[t],
                                preferred_element_type=jnp.float32)

    y_ref[...] = acc.reshape(1, th, w_out, cp)
    # Exact f32 partial statistics; reduced to GLOBAL batch stats outside.
    sum_ref[...] = jnp.sum(acc, axis=0, keepdims=True).reshape(1, 1, 1, cp)
    sq_ref[...] = jnp.sum(acc * acc, axis=0, keepdims=True).reshape(1, 1, 1, cp)


# --------------------------------------------------------------------------
# Kernel 2: normalize (folded scale/shift) + ReLU, lane-dense
# --------------------------------------------------------------------------
def bn_relu_kernel(y_ref, scale_ref, shift_ref, o_ref):
    cp = y_ref.shape[-1]
    sc = scale_ref[...].reshape(1, 1, 1, cp)
    sh = shift_ref[...].reshape(1, 1, 1, cp)
    o_ref[...] = jnp.maximum(y_ref[...] * sc + sh, 0.0).astype(o_ref.dtype)


# --------------------------------------------------------------------------
# pallas_call wrappers
# --------------------------------------------------------------------------
def _pick_row_tile(h, w, cp):
    """Largest divisor of H whose f32 output tile stays ~<=1 MiB; keep >=2
    row-tiles when the image is big enough so the pipeline actually streams."""
    max_rows = max(w, (1 << 20) // (cp * 4))
    best = 1
    for th in range(1, h + 1):
        if h % th:
            continue
        if th * w > max_rows:
            continue
        if h >= 16 and th == h:
            continue
        best = th
    return best


def _conv3x3_stats(xp, w_taps, cp, th):
    n, hp, wp, cin = xp.shape
    h, w = hp - 2, wp - 2
    n_h = h // th
    kernel = functools.partial(conv3x3_stats_kernel, th=th, w_out=w, cin=cin)
    return pl.pallas_call(
        kernel,
        grid=(n, n_h),
        in_specs=[
            # Whole padded image per n: block index constant along h -> no re-DMA.
            pl.BlockSpec((1, hp, wp, cin), lambda i, j: (i, 0, 0, 0)),
            # Weights resident in VMEM for the whole grid.
            pl.BlockSpec((9, cin, cp), lambda i, j: (0, 0, 0)),
        ],
        out_specs=(
            pl.BlockSpec((1, th, w, cp), lambda i, j: (i, j, 0, 0)),
            pl.BlockSpec((1, 1, 1, cp), lambda i, j: (i, j, 0, 0)),
            pl.BlockSpec((1, 1, 1, cp), lambda i, j: (i, j, 0, 0)),
        ),
        out_shape=(
            jax.ShapeDtypeStruct((n, h, w, cp), jnp.float32),
            jax.ShapeDtypeStruct((n, n_h, 1, cp), jnp.float32),
            jax.ShapeDtypeStruct((n, n_h, 1, cp), jnp.float32),
        ),
        compiler_params=pltpu.CompilerParams(
            dimension_semantics=("parallel", "parallel"),
            vmem_limit_bytes=_VMEM_LIMIT,
        ),
    )(xp, w_taps)


def _bn_relu(y, scale, shift, th, out_dtype):
    n, h, w, cp = y.shape
    n_h = h // th
    return pl.pallas_call(
        bn_relu_kernel,
        grid=(n, n_h),
        in_specs=[
            pl.BlockSpec((1, th, w, cp), lambda i, j: (i, j, 0, 0)),
            pl.BlockSpec((1, cp), lambda i, j: (0, 0)),
            pl.BlockSpec((1, cp), lambda i, j: (0, 0)),
        ],
        out_specs=pl.BlockSpec((1, th, w, cp), lambda i, j: (i, j, 0, 0)),
        out_shape=jax.ShapeDtypeStruct((n, h, w, cp), out_dtype),
        compiler_params=pltpu.CompilerParams(
            dimension_semantics=("parallel", "parallel"),
            vmem_limit_bytes=_VMEM_LIMIT,
        ),
    )(y, scale.reshape(1, cp), shift.reshape(1, cp))


# --------------------------------------------------------------------------
# Layer / module glue
# --------------------------------------------------------------------------
def _prep_weight(w_oihw, cin_x, cp):
    """(Cout, Cin, 3, 3) torch layout -> (9, Cin_x, Cp) tap-major bf16,
    zero-padded on both channel axes."""
    cout, cin = w_oihw.shape[0], w_oihw.shape[1]
    w = jnp.transpose(w_oihw, (2, 3, 1, 0))                     # (3, 3, Cin, Cout)
    w = jnp.pad(w, ((0, 0), (0, 0), (0, cin_x - cin), (0, cp - cout)))
    return w.reshape(9, cin_x, cp).astype(jnp.bfloat16)


def _conv_bn_relu_layer(x_nhwc, w_oihw, gamma, beta, cp):
    """Conv3x3(pad=1, bias=False) -> BatchNorm2d(batch stats) -> ReLU.

    x_nhwc: (N, H, W, Cin_x) f32 (Cin_x may include zero-padded channels).
    Returns (N, H, W, Cp) f32 with channels >= Cout exactly zero.
    """
    n, h, w, cin_x = x_nhwc.shape
    cout = w_oihw.shape[0]
    w_taps = _prep_weight(w_oihw, cin_x, cp)
    th = _pick_row_tile(h, w, cp)

    xp = jnp.pad(x_nhwc, ((0, 0), (1, 1), (1, 1), (0, 0)))      # spatial padding=1
    y, psum, psq = _conv3x3_stats(xp, w_taps, cp, th)

    # Global (over N*H*W) BN batch statistics from per-tile partial sums, then
    # fold mean/var/gamma/beta into one scale/shift pair (single FMA in pass 2).
    cnt = jnp.float32(n * h * w)
    mean = jnp.sum(psum, axis=(0, 1, 2)) / cnt                  # (Cp,)
    ex2 = jnp.sum(psq, axis=(0, 1, 2)) / cnt
    var = jnp.maximum(ex2 - mean * mean, 0.0)                   # biased variance
    g = jnp.pad(gamma.astype(jnp.float32), (0, cp - cout))      # padded chans -> 0
    b = jnp.pad(beta.astype(jnp.float32), (0, cp - cout))
    scale = g * jax.lax.rsqrt(var + _BN_EPS)
    shift = b - mean * scale
    return _bn_relu(y, scale, shift, th, jnp.float32)


@jax.jit
def double_conv(x_nchw, params):
    """Forward of DoubleConv.  Input/output are NCHW f32 (PyTorch convention)."""
    w1, g1, b1, w2, g2, b2 = params
    cmid, cout = w1.shape[0], w2.shape[0]
    cmid_p = _round_up(cmid, _LANES)
    cout_p = _round_up(cout, _LANES)

    x = jnp.transpose(x_nchw, (0, 2, 3, 1)).astype(jnp.float32)  # NCHW -> NHWC
    h1 = _conv_bn_relu_layer(x, w1, g1, b1, cmid_p)              # stays padded NHWC
    y = _conv_bn_relu_layer(h1, w2, g2, b2, cout_p)
    return jnp.transpose(y[..., :cout], (0, 3, 1, 2))            # NHWC -> NCHW


def init_params(key, in_channels, out_channels, mid_channels=None):
    if not mid_channels:
        mid_channels = out_channels
    k1, k2, k3, k4, k5, k6 = jax.random.split(key, 6)
    w1 = 0.1 * jax.random.normal(k1, (mid_channels, in_channels, 3, 3), jnp.float32)
    w2 = 0.1 * jax.random.normal(k2, (out_channels, mid_channels, 3, 3), jnp.float32)
    g1 = 1.0 + 0.1 * jax.random.normal(k3, (mid_channels,), jnp.float32)
    b1 = 0.1 * jax.random.normal(k4, (mid_channels,), jnp.float32)
    g2 = 1.0 + 0.1 * jax.random.normal(k5, (out_channels,), jnp.float32)
    b2 = 0.1 * jax.random.normal(k6, (out_channels,), jnp.float32)
    return (w1, g1, b1, w2, g2, b2)


def _reference(x_nchw, params):
    """Pure-JAX f32 reference matching PyTorch training-mode forward."""
    def block(x, w, g, b):
        y = jax.lax.conv_general_dilated(
            x, w, window_strides=(1, 1), padding=((1, 1), (1, 1)),
            dimension_numbers=("NCHW", "OIHW", "NCHW"))
        mean = jnp.mean(y, axis=(0, 2, 3), keepdims=True)
        var = jnp.mean((y - mean) ** 2, axis=(0, 2, 3), keepdims=True)
        y = (y - mean) * jax.lax.rsqrt(var + _BN_EPS)
        y = y * g.reshape(1, -1, 1, 1) + b.reshape(1, -1, 1, 1)
        return jnp.maximum(y, 0.0)

    w1, g1, b1, w2, g2, b2 = params
    return block(block(x_nchw, w1, g1, b1), w2, g2, b2)


if __name__ == "__main__":
    key = jax.random.PRNGKey(0)
    k_x, k_p = jax.random.split(key)

    N, Cin, H, W = 2, 4, 16, 16
    Cout = 8  # mid_channels defaults to out_channels

    x = jax.random.normal(k_x, (N, Cin, H, W), jnp.float32)      # NCHW like PyTorch
    params = init_params(k_p, Cin, Cout)

    out = jax.block_until_ready(double_conv(x, params))

    assert out.shape == (N, Cout, H, W), out.shape
    assert out.dtype == jnp.float32
    assert bool(jnp.all(out >= 0.0))                             # ReLU output

    # bf16 MXU operands vs f32 reference: expect well under a few % of scale.
    ref = jax.block_until_ready(_reference(x, params))
    err = float(jnp.max(jnp.abs(out - ref)) / (jnp.max(jnp.abs(ref)) + 1e-6))
    assert err < 0.08, f"mismatch vs f32 reference: rel={err:.4f}"

    print("KERNEL_OK")
</pallas_src>

<mosaic_0001>
module attributes {stable_mosaic.version = 11 : i64} {
  func.func @conv3x3_stats_kernel(%arg0: i32, %arg1: i32, %arg2: memref<1x18x18x4xf32, #tpu.memory_space<vmem>>, %arg3: memref<9x4x128xbf16, #tpu.memory_space<vmem>>, %arg4: memref<1x8x16x128xf32, #tpu.memory_space<vmem>>, %arg5: memref<1x1x1x128xf32, #tpu.memory_space<vmem>>, %arg6: memref<1x1x1x128xf32, #tpu.memory_space<vmem>>) attributes {dimension_semantics = [#tpu.dimension_semantics<parallel>, #tpu.dimension_semantics<parallel>], iteration_bounds = array<i64: 2, 2>, scalar_prefetch = 0 : i64, scratch_operands = 0 : i64, tpu.core_type = #tpu.core_type<tc>, window_params = [{transform_indices = @transform_0, window_bounds = array<i64: 1, 18, 18, 4>}, {pipeline_mode = #tpu.pipeline_mode<synchronous>, transform_indices = @transform_1, window_bounds = array<i64: 9, 4, 128>}, {transform_indices = @transform_2, window_bounds = array<i64: 1, 8, 16, 128>}, {transform_indices = @transform_3, window_bounds = array<i64: 1, 1, 1, 128>}, {transform_indices = @transform_4, window_bounds = array<i64: 1, 1, 1, 128>}]} {
    %c8_i32 = arith.constant 8 : i32
    %0 = arith.muli %arg1, %c8_i32 : i32
    %1 = tpu.assume_multiple %0, 8 : i32
    %c0_i32 = arith.constant 0 : i32
    %2 = arith.addi %1, %c0_i32 : i32
    %c0 = arith.constant 0 : index
    %3 = arith.index_cast %2 : i32 to index
    %c0_0 = arith.constant 0 : index
    %c0_1 = arith.constant 0 : index
    %4 = vector.load %arg2[%c0, %3, %c0_0, %c0_1] : memref<1x18x18x4xf32, #tpu.memory_space<vmem>>, vector<1x8x16x4xf32>
    %5 = arith.truncf %4 : vector<1x8x16x4xf32> to vector<1x8x16x4xbf16>
    %c0_i32_2 = arith.constant 0 : i32
    %6 = arith.addi %1, %c0_i32_2 : i32
    %c0_3 = arith.constant 0 : index
    %7 = arith.index_cast %6 : i32 to index
    %c1 = arith.constant 1 : index
    %c0_4 = arith.constant 0 : index
    %8 = vector.load %arg2[%c0_3, %7, %c1, %c0_4] : memref<1x18x18x4xf32, #tpu.memory_space<vmem>>, vector<1x8x16x4xf32>
    %9 = arith.truncf %8 : vector<1x8x16x4xf32> to vector<1x8x16x4xbf16>
    %c0_i32_5 = arith.constant 0 : i32
    %10 = arith.addi %1, %c0_i32_5 : i32
    %c0_6 = arith.constant 0 : index
    %11 = arith.index_cast %10 : i32 to index
    %c2 = arith.constant 2 : index
    %c0_7 = arith.constant 0 : index
    %12 = vector.load %arg2[%c0_6, %11, %c2, %c0_7] : memref<1x18x18x4xf32, #tpu.memory_space<vmem>>, vector<1x8x16x4xf32>
    %13 = arith.truncf %12 : vector<1x8x16x4xf32> to vector<1x8x16x4xbf16>
    %c1_i32 = arith.constant 1 : i32
    %14 = arith.addi %1, %c1_i32 : i32
    %c0_8 = arith.constant 0 : index
    %15 = arith.index_cast %14 : i32 to index
    %c0_9 = arith.constant 0 : index
    %c0_10 = arith.constant 0 : index
    %16 = vector.load %arg2[%c0_8, %15, %c0_9, %c0_10] : memref<1x18x18x4xf32, #tpu.memory_space<vmem>>, vector<1x8x16x4xf32>
    %17 = arith.truncf %16 : vector<1x8x16x4xf32> to vector<1x8x16x4xbf16>
    %c1_i32_11 = arith.constant 1 : i32
    %18 = arith.addi %1, %c1_i32_11 : i32
    %c0_12 = arith.constant 0 : index
    %19 = arith.index_cast %18 : i32 to index
    %c1_13 = arith.constant 1 : index
    %c0_14 = arith.constant 0 : index
    %20 = vector.load %arg2[%c0_12, %19, %c1_13, %c0_14] : memref<1x18x18x4xf32, #tpu.memory_space<vmem>>, vector<1x8x16x4xf32>
    %21 = arith.truncf %20 : vector<1x8x16x4xf32> to vector<1x8x16x4xbf16>
    %c1_i32_15 = arith.constant 1 : i32
    %22 = arith.addi %1, %c1_i32_15 : i32
    %c0_16 = arith.constant 0 : index
    %23 = arith.index_cast %22 : i32 to index
    %c2_17 = arith.constant 2 : index
    %c0_18 = arith.constant 0 : index
    %24 = vector.load %arg2[%c0_16, %23, %c2_17, %c0_18] : memref<1x18x18x4xf32, #tpu.memory_space<vmem>>, vector<1x8x16x4xf32>
    %25 = arith.truncf %24 : vector<1x8x16x4xf32> to vector<1x8x16x4xbf16>
    %c2_i32 = arith.constant 2 : i32
    %26 = arith.addi %1, %c2_i32 : i32
    %c0_19 = arith.constant 0 : index
    %27 = arith.index_cast %26 : i32 to index
    %c0_20 = arith.constant 0 : index
    %c0_21 = arith.constant 0 : index
    %28 = vector.load %arg2[%c0_19, %27, %c0_20, %c0_21] : memref<1x18x18x4xf32, #tpu.memory_space<vmem>>, vector<1x8x16x4xf32>
    %29 = arith.truncf %28 : vector<1x8x16x4xf32> to vector<1x8x16x4xbf16>
    %c2_i32_22 = arith.constant 2 : i32
    %30 = arith.addi %1, %c2_i32_22 : i32
    %c0_23 = arith.constant 0 : index
    %31 = arith.index_cast %30 : i32 to index
    %c1_24 = arith.constant 1 : index
    %c0_25 = arith.constant 0 : index
    %32 = vector.load %arg2[%c0_23, %31, %c1_24, %c0_25] : memref<1x18x18x4xf32, #tpu.memory_space<vmem>>, vector<1x8x16x4xf32>
    %33 = arith.truncf %32 : vector<1x8x16x4xf32> to vector<1x8x16x4xbf16>
    %c2_i32_26 = arith.constant 2 : i32
    %34 = arith.addi %1, %c2_i32_26 : i32
    %c0_27 = arith.constant 0 : index
    %35 = arith.index_cast %34 : i32 to index
    %c2_28 = arith.constant 2 : index
    %c0_29 = arith.constant 0 : index
    %36 = vector.load %arg2[%c0_27, %35, %c2_28, %c0_29] : memref<1x18x18x4xf32, #tpu.memory_space<vmem>>, vector<1x8x16x4xf32>
    %37 = arith.truncf %36 : vector<1x8x16x4xf32> to vector<1x8x16x4xbf16>
    %cst = arith.constant 0.000000e+00 : f32
    %38 = vector.broadcast %cst : f32 to vector<128x128xf32>
    %39 = vector.shape_cast %5 : vector<1x8x16x4xbf16> to vector<128x4xbf16>
    %c0_30 = arith.constant 0 : index
    %c0_31 = arith.constant 0 : index
    %c0_32 = arith.constant 0 : index
    %40 = vector.load %arg3[%c0_30, %c0_31, %c0_32] : memref<9x4x128xbf16, #tpu.memory_space<vmem>>, vector<1x4x128xbf16>
    %41 = vector.shape_cast %40 : vector<1x4x128xbf16> to vector<4x128xbf16>
    %cst_33 = arith.constant dense<0.000000e+00> : vector<128x128xf32>
    %42 = tpu.matmul %39, %41, %cst_33 {dimension_numbers = #tpu.dot_dimension_numbers<[1], [0], [0], [1], [0, 0, 1, 1], [], []>} : vector<128x4xbf16>, vector<4x128xbf16>, vector<128x128xf32> -> vector<128x128xf32>
    %43 = arith.addf %38, %42 : vector<128x128xf32>
    %44 = vector.shape_cast %9 : vector<1x8x16x4xbf16> to vector<128x4xbf16>
    %c1_34 = arith.constant 1 : index
    %c0_35 = arith.constant 0 : index
    %c0_36 = arith.constant 0 : index
    %45 = vector.load %arg3[%c1_34, %c0_35, %c0_36] : memref<9x4x128xbf16, #tpu.memory_space<vmem>>, vector<1x4x128xbf16>
    %46 = vector.shape_cast %45 : vector<1x4x128xbf16> to vector<4x128xbf16>
    %cst_37 = arith.constant dense<0.000000e+00> : vector<128x128xf32>
    %47 = tpu.matmul %44, %46, %cst_37 {dimension_numbers = #tpu.dot_dimension_numbers<[1], [0], [0], [1], [0, 0, 1, 1], [], []>} : vector<128x4xbf16>, vector<4x128xbf16>, vector<128x128xf32> -> vector<128x128xf32>
    %48 = arith.addf %43, %47 : vector<128x128xf32>
    %49 = vector.shape_cast %13 : vector<1x8x16x4xbf16> to vector<128x4xbf16>
    %c2_38 = arith.constant 2 : index
    %c0_39 = arith.constant 0 : index
    %c0_40 = arith.constant 0 : index
    %50 = vector.load %arg3[%c2_38, %c0_39, %c0_40] : memref<9x4x128xbf16, #tpu.memory_space<vmem>>, vector<1x4x128xbf16>
    %51 = vector.shape_cast %50 : vector<1x4x128xbf16> to vector<4x128xbf16>
    %cst_41 = arith.constant dense<0.000000e+00> : vector<128x128xf32>
    %52 = tpu.matmul %49, %51, %cst_41 {dimension_numbers = #tpu.dot_dimension_numbers<[1], [0], [0], [1], [0, 0, 1, 1], [], []>} : vector<128x4xbf16>, vector<4x128xbf16>, vector<128x128xf32> -> vector<128x128xf32>
    %53 = arith.addf %48, %52 : vector<128x128xf32>
    %54 = vector.shape_cast %17 : vector<1x8x16x4xbf16> to vector<128x4xbf16>
    %c3 = arith.constant 3 : index
    %c0_42 = arith.constant 0 : index
    %c0_43 = arith.constant 0 : index
    %55 = vector.load %arg3[%c3, %c0_42, %c0_43] : memref<9x4x128xbf16, #tpu.memory_space<vmem>>, vector<1x4x128xbf16>
    %56 = vector.shape_cast %55 : vector<1x4x128xbf16> to vector<4x128xbf16>
    %cst_44 = arith.constant dense<0.000000e+00> : vector<128x128xf32>
    %57 = tpu.matmul %54, %56, %cst_44 {dimension_numbers = #tpu.dot_dimension_numbers<[1], [0], [0], [1], [0, 0, 1, 1], [], []>} : vector<128x4xbf16>, vector<4x128xbf16>, vector<128x128xf32> -> vector<128x128xf32>
    %58 = arith.addf %53, %57 : vector<128x128xf32>
    %59 = vector.shape_cast %21 : vector<1x8x16x4xbf16> to vector<128x4xbf16>
    %c4 = arith.constant 4 : index
    %c0_45 = arith.constant 0 : index
    %c0_46 = arith.constant 0 : index
    %60 = vector.load %arg3[%c4, %c0_45, %c0_46] : memref<9x4x128xbf16, #tpu.memory_space<vmem>>, vector<1x4x128xbf16>
    %61 = vector.shape_cast %60 : vector<1x4x128xbf16> to vector<4x128xbf16>
    %cst_47 = arith.constant dense<0.000000e+00> : vector<128x128xf32>
    %62 = tpu.matmul %59, %61, %cst_47 {dimension_numbers = #tpu.dot_dimension_numbers<[1], [0], [0], [1], [0, 0, 1, 1], [], []>} : vector<128x4xbf16>, vector<4x128xbf16>, vector<128x128xf32> -> vector<128x128xf32>
    %63 = arith.addf %58, %62 : vector<128x128xf32>
    %64 = vector.shape_cast %25 : vector<1x8x16x4xbf16> to vector<128x4xbf16>
    %c5 = arith.constant 5 : index
    %c0_48 = arith.constant 0 : index
    %c0_49 = arith.constant 0 : index
    %65 = vector.load %arg3[%c5, %c0_48, %c0_49] : memref<9x4x128xbf16, #tpu.memory_space<vmem>>, vector<1x4x128xbf16>
    %66 = vector.shape_cast %65 : vector<1x4x128xbf16> to vector<4x128xbf16>
    %cst_50 = arith.constant dense<0.000000e+00> : vector<128x128xf32>
    %67 = tpu.matmul %64, %66, %cst_50 {dimension_numbers = #tpu.dot_dimension_numbers<[1], [0], [0], [1], [0, 0, 1, 1], [], []>} : vector<128x4xbf16>, vector<4x128xbf16>, vector<128x128xf32> -> vector<128x128xf32>
    %68 = arith.addf %63, %67 : vector<128x128xf32>
    %69 = vector.shape_cast %29 : vector<1x8x16x4xbf16> to vector<128x4xbf16>
    %c6 = arith.constant 6 : index
    %c0_51 = arith.constant 0 : index
    %c0_52 = arith.constant 0 : index
    %70 = vector.load %arg3[%c6, %c0_51, %c0_52] : memref<9x4x128xbf16, #tpu.memory_space<vmem>>, vector<1x4x128xbf16>
    %71 = vector.shape_cast %70 : vector<1x4x128xbf16> to vector<4x128xbf16>
    %cst_53 = arith.constant dense<0.000000e+00> : vector<128x128xf32>
    %72 = tpu.matmul %69, %71, %cst_53 {dimension_numbers = #tpu.dot_dimension_numbers<[1], [0], [0], [1], [0, 0, 1, 1], [], []>} : vector<128x4xbf16>, vector<4x128xbf16>, vector<128x128xf32> -> vector<128x128xf32>
    %73 = arith.addf %68, %72 : vector<128x128xf32>
    %74 = vector.shape_cast %33 : vector<1x8x16x4xbf16> to vector<128x4xbf16>
    %c7 = arith.constant 7 : index
    %c0_54 = arith.constant 0 : index
    %c0_55 = arith.constant 0 : index
    %75 = vector.load %arg3[%c7, %c0_54, %c0_55] : memref<9x4x128xbf16, #tpu.memory_space<vmem>>, vector<1x4x128xbf16>
    %76 = vector.shape_cast %75 : vector<1x4x128xbf16> to vector<4x128xbf16>
    %cst_56 = arith.constant dense<0.000000e+00> : vector<128x128xf32>
    %77 = tpu.matmul %74, %76, %cst_56 {dimension_numbers = #tpu.dot_dimension_numbers<[1], [0], [0], [1], [0, 0, 1, 1], [], []>} : vector<128x4xbf16>, vector<4x128xbf16>, vector<128x128xf32> -> vector<128x128xf32>
    %78 = arith.addf %73, %77 : vector<128x128xf32>
    %79 = vector.shape_cast %37 : vector<1x8x16x4xbf16> to vector<128x4xbf16>
    %c8 = arith.constant 8 : index
    %c0_57 = arith.constant 0 : index
    %c0_58 = arith.constant 0 : index
    %80 = vector.load %arg3[%c8, %c0_57, %c0_58] : memref<9x4x128xbf16, #tpu.memory_space<vmem>>, vector<1x4x128xbf16>
    %81 = vector.shape_cast %80 : vector<1x4x128xbf16> to vector<4x128xbf16>
    %cst_59 = arith.constant dense<0.000000e+00> : vector<128x128xf32>
    %82 = tpu.matmul %79, %81, %cst_59 {dimension_numbers = #tpu.dot_dimension_numbers<[1], [0], [0], [1], [0, 0, 1, 1], [], []>} : vector<128x4xbf16>, vector<4x128xbf16>, vector<128x128xf32> -> vector<128x128xf32>
    %83 = arith.addf %78, %82 : vector<128x128xf32>
    %84 = vector.shape_cast %83 : vector<128x128xf32> to vector<1x8x16x128xf32>
    %c0_60 = arith.constant 0 : index
    %c0_61 = arith.constant 0 : index
    %c0_62 = arith.constant 0 : index
    %c0_63 = arith.constant 0 : index
    %85 = vector.load %arg4[%c0_60, %c0_61, %c0_62, %c0_63] : memref<1x8x16x128xf32, #tpu.memory_space<vmem>>, vector<1x8x16x128xf32>
    tpu.vector_store %arg4[%c0_60, %c0_61, %c0_62, %c0_63], %84 {strides = array<i32>} : memref<1x8x16x128xf32, #tpu.memory_space<vmem>>, vector<1x8x16x128xf32>,
    %cst_64 = arith.constant dense<0.000000e+00> : vector<128xf32>
    %86 = vector.multi_reduction <add>, %83, %cst_64 [0] : vector<128x128xf32> to vector<128xf32>
    %87 = vector.shape_cast %86 : vector<128xf32> to vector<1x128xf32>
    %88 = vector.shape_cast %87 : vector<1x128xf32> to vector<1x1x1x128xf32>
    %c0_65 = arith.constant 0 : index
    %c0_66 = arith.constant 0 : index
    %c0_67 = arith.constant 0 : index
    %c0_68 = arith.constant 0 : index
    %89 = vector.load %arg5[%c0_65, %c0_66, %c0_67, %c0_68] : memref<1x1x1x128xf32, #tpu.memory_space<vmem>>, vector<1x1x1x128xf32>
    tpu.vector_store %arg5[%c0_65, %c0_66, %c0_67, %c0_68], %88 {strides = array<i32>} : memref<1x1x1x128xf32, #tpu.memory_space<vmem>>, vector<1x1x1x128xf32>,
    %90 = arith.mulf %83, %83 : vector<128x128xf32>
    %cst_69 = arith.constant dense<0.000000e+00> : vector<128xf32>
    %91 = vector.multi_reduction <add>, %90, %cst_69 [0] : vector<128x128xf32> to vector<128xf32>
    %92 = vector.shape_cast %91 : vector<128xf32> to vector<1x128xf32>
    %93 = vector.shape_cast %92 : vector<1x128xf32> to vector<1x1x1x128xf32>
    %c0_70 = arith.constant 0 : index
    %c0_71 = arith.constant 0 : index
    %c0_72 = arith.constant 0 : index
    %c0_73 = arith.constant 0 : index
    %94 = vector.load %arg6[%c0_70, %c0_71, %c0_72, %c0_73] : memref<1x1x1x128xf32, #tpu.memory_space<vmem>>, vector<1x1x1x128xf32>
    tpu.vector_store %arg6[%c0_70, %c0_71, %c0_72, %c0_73], %93 {strides = array<i32>} : memref<1x1x1x128xf32, #tpu.memory_space<vmem>>, vector<1x1x1x128xf32>,
    return
  }
  func.func @transform_0(%arg0: i32, %arg1: i32) -> (i32, i32, i32, i32) {
    %c0_i32 = arith.constant 0 : i32
    %c0_i32_0 = arith.constant 0 : i32
    %c0_i32_1 = arith.constant 0 : i32
    %c0_i32_2 = arith.constant 0 : i32
    return %arg0, %c0_i32, %c0_i32_0, %c0_i32_1 : i32, i32, i32, i32
  }
  func.func @transform_1(%arg0: i32, %arg1: i32) -> (i32, i32, i32) {
    %c0_i32 = arith.constant 0 : i32
    %c0_i32_0 = arith.constant 0 : i32
    %c0_i32_1 = arith.constant 0 : i32
    %c0_i32_2 = arith.constant 0 : i32
    return %c0_i32, %c0_i32_0, %c0_i32_1 : i32, i32, i32
  }
  func.func @transform_2(%arg0: i32, %arg1: i32) -> (i32, i32, i32, i32) {
    %c0_i32 = arith.constant 0 : i32
    %c0_i32_0 = arith.constant 0 : i32
    %c0_i32_1 = arith.constant 0 : i32
    return %arg0, %arg1, %c0_i32, %c0_i32_0 : i32, i32, i32, i32
  }
  func.func @transform_3(%arg0: i32, %arg1: i32) -> (i32, i32, i32, i32) {
    %c0_i32 = arith.constant 0 : i32
    %c0_i32_0 = arith.constant 0 : i32
    %c0_i32_1 = arith.constant 0 : i32
    return %arg0, %arg1, %c0_i32, %c0_i32_0 : i32, i32, i32, i32
  }
  func.func @transform_4(%arg0: i32, %arg1: i32) -> (i32, i32, i32, i32) {
    %c0_i32 = arith.constant 0 : i32
    %c0_i32_0 = arith.constant 0 : i32
    %c0_i32_1 = arith.constant 0 : i32
    return %arg0, %arg1, %c0_i32, %c0_i32_0 : i32, i32, i32, i32
  }
}

module attributes {stable_mosaic.version = 11 : i64} {
  func.func @bn_relu_kernel(%arg0: i32, %arg1: i32, %arg2: memref<1x8x16x128xf32, #tpu.memory_space<vmem>>, %arg3: memref<1x128xf32, #tpu.memory_space<vmem>>, %arg4: memref<1x128xf32, #tpu.memory_space<vmem>>, %arg5: memref<1x8x16x128xf32, #tpu.memory_space<vmem>>) attributes {dimension_semantics = [#tpu.dimension_semantics<parallel>, #tpu.dimension_semantics<parallel>], iteration_bounds = array<i64: 2, 2>, scalar_prefetch = 0 : i64, scratch_operands = 0 : i64, tpu.core_type = #tpu.core_type<tc>, window_params = [{transform_indices = @transform_0, window_bounds = array<i64: 1, 8, 16, 128>}, {pipeline_mode = #tpu.pipeline_mode<synchronous>, transform_indices = @transform_1, window_bounds = array<i64: 1, 128>}, {pipeline_mode = #tpu.pipeline_mode<synchronous>, transform_indices = @transform_2, window_bounds = array<i64: 1, 128>}, {transform_indices = @transform_3, window_bounds = array<i64: 1, 8, 16, 128>}]} {
    %c0 = arith.constant 0 : index
    %c0_0 = arith.constant 0 : index
    %0 = vector.load %arg3[%c0, %c0_0] : memref<1x128xf32, #tpu.memory_space<vmem>>, vector<1x128xf32>
    %1 = vector.shape_cast %0 : vector<1x128xf32> to vector<1x1x1x128xf32>
    %c0_1 = arith.constant 0 : index
    %c0_2 = arith.constant 0 : index
    %2 = vector.load %arg4[%c0_1, %c0_2] : memref<1x128xf32, #tpu.memory_space<vmem>>, vector<1x128xf32>
    %3 = vector.shape_cast %2 : vector<1x128xf32> to vector<1x1x1x128xf32>
    %c0_3 = arith.constant 0 : index
    %c0_4 = arith.constant 0 : index
    %c0_5 = arith.constant 0 : index
    %c0_6 = arith.constant 0 : index
    %4 = vector.load %arg2[%c0_3, %c0_4, %c0_5, %c0_6] : memref<1x8x16x128xf32, #tpu.memory_space<vmem>>, vector<1x8x16x128xf32>
    %5 = vector.broadcast %1 : vector<1x1x1x128xf32> to vector<1x8x16x128xf32>
    %6 = arith.mulf %4, %5 : vector<1x8x16x128xf32>
    %7 = vector.broadcast %3 : vector<1x1x1x128xf32> to vector<1x8x16x128xf32>
    %8 = arith.addf %6, %7 : vector<1x8x16x128xf32>
    %cst = arith.constant 0.000000e+00 : f32
    %9 = vector.broadcast %cst : f32 to vector<1x8x16x128xf32>
    %10 = arith.maximumf %8, %9 : vector<1x8x16x128xf32>
    %c0_7 = arith.constant 0 : index
    %c0_8 = arith.constant 0 : index
    %c0_9 = arith.constant 0 : index
    %c0_10 = arith.constant 0 : index
    %11 = vector.load %arg5[%c0_7, %c0_8, %c0_9, %c0_10] : memref<1x8x16x128xf32, #tpu.memory_space<vmem>>, vector<1x8x16x128xf32>
    tpu.vector_store %arg5[%c0_7, %c0_8, %c0_9, %c0_10], %10 {strides = array<i32>} : memref<1x8x16x128xf32, #tpu.memory_space<vmem>>, vector<1x8x16x128xf32>,
    return
  }
  func.func @transform_0(%arg0: i32, %arg1: i32) -> (i32, i32, i32, i32) {
    %c0_i32 = arith.constant 0 : i32
    %c0_i32_0 = arith.constant 0 : i32
    %c0_i32_1 = arith.constant 0 : i32
    return %arg0, %arg1, %c0_i32, %c0_i32_0 : i32, i32, i32, i32
  }
  func.func @transform_1(%arg0: i32, %arg1: i32) -> (i32, i32) {
    %c0_i32 = arith.constant 0 : i32
    %c0_i32_0 = arith.constant 0 : i32
    %c0_i32_1 = arith.constant 0 : i32
    return %c0_i32, %c0_i32_0 : i32, i32
  }
  func.func @transform_2(%arg0: i32, %arg1: i32) -> (i32, i32) {
    %c0_i32 = arith.constant 0 : i32
    %c0_i32_0 = arith.constant 0 : i32
    %c0_i32_1 = arith.constant 0 : i32
    return %c0_i32, %c0_i32_0 : i32, i32
  }
  func.func @transform_3(%arg0: i32, %arg1: i32) -> (i32, i32, i32, i32) {
    %c0_i32 = arith.constant 0 : i32
    %c0_i32_0 = arith.constant 0 : i32
    %c0_i32_1 = arith.constant 0 : i32
    return %arg0, %arg1, %c0_i32, %c0_i32_0 : i32, i32, i32, i32
  }
}

module attributes {stable_mosaic.version = 11 : i64} {
  func.func @conv3x3_stats_kernel(%arg0: i32, %arg1: i32, %arg2: memref<1x18x18x128xf32, #tpu.memory_space<vmem>>, %arg3: memref<9x128x128xbf16, #tpu.memory_space<vmem>>, %arg4: memref<1x8x16x128xf32, #tpu.memory_space<vmem>>, %arg5: memref<1x1x1x128xf32, #tpu.memory_space<vmem>>, %arg6: memref<1x1x1x128xf32, #tpu.memory_space<vmem>>) attributes {dimension_semantics = [#tpu.dimension_semantics<parallel>, #tpu.dimension_semantics<parallel>], iteration_bounds = array<i64: 2, 2>, scalar_prefetch = 0 : i64, scratch_operands = 0 : i64, tpu.core_type = #tpu.core_type<tc>, window_params = [{transform_indices = @transform_0, window_bounds = array<i64: 1, 18, 18, 128>}, {pipeline_mode = #tpu.pipeline_mode<synchronous>, transform_indices = @transform_1, window_bounds = array<i64: 9, 128, 128>}, {transform_indices = @transform_2, window_bounds = array<i64: 1, 8, 16, 128>}, {transform_indices = @transform_3, window_bounds = array<i64: 1, 1, 1, 128>}, {transform_indices = @transform_4, window_bounds = array<i64: 1, 1, 1, 128>}]} {
    %c8_i32 = arith.constant 8 : i32
    %0 = arith.muli %arg1, %c8_i32 : i32
    %1 = tpu.assume_multiple %0, 8 : i32
    %c0_i32 = arith.constant 0 : i32
    %2 = arith.addi %1, %c0_i32 : i32
    %c0 = arith.constant 0 : index
    %3 = arith.index_cast %2 : i32 to index
    %c0_0 = arith.constant 0 : index
    %c0_1 = arith.constant 0 : index
    %4 = vector.load %arg2[%c0, %3, %c0_0, %c0_1] : memref<1x18x18x128xf32, #tpu.memory_space<vmem>>, vector<1x8x16x128xf32>
    %5 = arith.truncf %4 : vector<1x8x16x128xf32> to vector<1x8x16x128xbf16>
    %c0_i32_2 = arith.constant 0 : i32
    %6 = arith.addi %1, %c0_i32_2 : i32
    %c0_3 = arith.constant 0 : index
    %7 = arith.index_cast %6 : i32 to index
    %c1 = arith.constant 1 : index
    %c0_4 = arith.constant 0 : index
    %8 = vector.load %arg2[%c0_3, %7, %c1, %c0_4] : memref<1x18x18x128xf32, #tpu.memory_space<vmem>>, vector<1x8x16x128xf32>
    %9 = arith.truncf %8 : vector<1x8x16x128xf32> to vector<1x8x16x128xbf16>
    %c0_i32_5 = arith.constant 0 : i32
    %10 = arith.addi %1, %c0_i32_5 : i32
    %c0_6 = arith.constant 0 : index
    %11 = arith.index_cast %10 : i32 to index
    %c2 = arith.constant 2 : index
    %c0_7 = arith.constant 0 : index
    %12 = vector.load %arg2[%c0_6, %11, %c2, %c0_7] : memref<1x18x18x128xf32, #tpu.memory_space<vmem>>, vector<1x8x16x128xf32>
    %13 = arith.truncf %12 : vector<1x8x16x128xf32> to vector<1x8x16x128xbf16>
    %c1_i32 = arith.constant 1 : i32
    %14 = arith.addi %1, %c1_i32 : i32
    %c0_8 = arith.constant 0 : index
    %15 = arith.index_cast %14 : i32 to index
    %c0_9 = arith.constant 0 : index
    %c0_10 = arith.constant 0 : index
    %16 = vector.load %arg2[%c0_8, %15, %c0_9, %c0_10] : memref<1x18x18x128xf32, #tpu.memory_space<vmem>>, vector<1x8x16x128xf32>
    %17 = arith.truncf %16 : vector<1x8x16x128xf32> to vector<1x8x16x128xbf16>
    %c1_i32_11 = arith.constant 1 : i32
    %18 = arith.addi %1, %c1_i32_11 : i32
    %c0_12 = arith.constant 0 : index
    %19 = arith.index_cast %18 : i32 to index
    %c1_13 = arith.constant 1 : index
    %c0_14 = arith.constant 0 : index
    %20 = vector.load %arg2[%c0_12, %19, %c1_13, %c0_14] : memref<1x18x18x128xf32, #tpu.memory_space<vmem>>, vector<1x8x16x128xf32>
    %21 = arith.truncf %20 : vector<1x8x16x128xf32> to vector<1x8x16x128xbf16>
    %c1_i32_15 = arith.constant 1 : i32
    %22 = arith.addi %1, %c1_i32_15 : i32
    %c0_16 = arith.constant 0 : index
    %23 = arith.index_cast %22 : i32 to index
    %c2_17 = arith.constant 2 : index
    %c0_18 = arith.constant 0 : index
    %24 = vector.load %arg2[%c0_16, %23, %c2_17, %c0_18] : memref<1x18x18x128xf32, #tpu.memory_space<vmem>>, vector<1x8x16x128xf32>
    %25 = arith.truncf %24 : vector<1x8x16x128xf32> to vector<1x8x16x128xbf16>
    %c2_i32 = arith.constant 2 : i32
    %26 = arith.addi %1, %c2_i32 : i32
    %c0_19 = arith.constant 0 : index
    %27 = arith.index_cast %26 : i32 to index
    %c0_20 = arith.constant 0 : index
    %c0_21 = arith.constant 0 : index
    %28 = vector.load %arg2[%c0_19, %27, %c0_20, %c0_21] : memref<1x18x18x128xf32, #tpu.memory_space<vmem>>, vector<1x8x16x128xf32>
    %29 = arith.truncf %28 : vector<1x8x16x128xf32> to vector<1x8x16x128xbf16>
    %c2_i32_22 = arith.constant 2 : i32
    %30 = arith.addi %1, %c2_i32_22 : i32
    %c0_23 = arith.constant 0 : index
    %31 = arith.index_cast %30 : i32 to index
    %c1_24 = arith.constant 1 : index
    %c0_25 = arith.constant 0 : index
    %32 = vector.load %arg2[%c0_23, %31, %c1_24, %c0_25] : memref<1x18x18x128xf32, #tpu.memory_space<vmem>>, vector<1x8x16x128xf32>
    %33 = arith.truncf %32 : vector<1x8x16x128xf32> to vector<1x8x16x128xbf16>
    %c2_i32_26 = arith.constant 2 : i32
    %34 = arith.addi %1, %c2_i32_26 : i32
    %c0_27 = arith.constant 0 : index
    %35 = arith.index_cast %34 : i32 to index
    %c2_28 = arith.constant 2 : index
    %c0_29 = arith.constant 0 : index
    %36 = vector.load %arg2[%c0_27, %35, %c2_28, %c0_29] : memref<1x18x18x128xf32, #tpu.memory_space<vmem>>, vector<1x8x16x128xf32>
    %37 = arith.truncf %36 : vector<1x8x16x128xf32> to vector<1x8x16x128xbf16>
    %38 = tpu.concatenate %5, %9, %13, %17, %21, %25, %29, %33, %37 in 3 : vector<1x8x16x128xbf16>, vector<1x8x16x128xbf16>, vector<1x8x16x128xbf16>, vector<1x8x16x128xbf16>, vector<1x8x16x128xbf16>, vector<1x8x16x128xbf16>, vector<1x8x16x128xbf16>, vector<1x8x16x128xbf16>, vector<1x8x16x128xbf16> -> vector<1x8x16x1152xbf16>
    %39 = vector.shape_cast %38 : vector<1x8x16x1152xbf16> to vector<128x1152xbf16>
    %c0_30 = arith.constant 0 : index
    %c0_31 = arith.constant 0 : index
    %c0_32 = arith.constant 0 : index
    %40 = vector.load %arg3[%c0_30, %c0_31, %c0_32] : memref<9x128x128xbf16, #tpu.memory_space<vmem>>, vector<9x128x128xbf16>
    %41 = vector.shape_cast %40 : vector<9x128x128xbf16> to vector<1152x128xbf16>
    %cst = arith.constant dense<0.000000e+00> : vector<128x128xf32>
    %42 = tpu.matmul %39, %41, %cst {dimension_numbers = #tpu.dot_dimension_numbers<[1], [0], [0], [1], [0, 0, 1, 1], [], []>} : vector<128x1152xbf16>, vector<1152x128xbf16>, vector<128x128xf32> -> vector<128x128xf32>
    %43 = vector.shape_cast %42 : vector<128x128xf32> to vector<1x8x16x128xf32>
    %c0_33 = arith.constant 0 : index
    %c0_34 = arith.constant 0 : index
    %c0_35 = arith.constant 0 : index
    %c0_36 = arith.constant 0 : index
    %44 = vector.load %arg4[%c0_33, %c0_34, %c0_35, %c0_36] : memref<1x8x16x128xf32, #tpu.memory_space<vmem>>, vector<1x8x16x128xf32>
    tpu.vector_store %arg4[%c0_33, %c0_34, %c0_35, %c0_36], %43 {strides = array<i32>} : memref<1x8x16x128xf32, #tpu.memory_space<vmem>>, vector<1x8x16x128xf32>,
    %cst_37 = arith.constant dense<0.000000e+00> : vector<128xf32>
    %45 = vector.multi_reduction <add>, %42, %cst_37 [0] : vector<128x128xf32> to vector<128xf32>
    %46 = vector.shape_cast %45 : vector<128xf32> to vector<1x128xf32>
    %47 = vector.shape_cast %46 : vector<1x128xf32> to vector<1x1x1x128xf32>
    %c0_38 = arith.constant 0 : index
    %c0_39 = arith.constant 0 : index
    %c0_40 = arith.constant 0 : index
    %c0_41 = arith.constant 0 : index
    %48 = vector.load %arg5[%c0_38, %c0_39, %c0_40, %c0_41] : memref<1x1x1x128xf32, #tpu.memory_space<vmem>>, vector<1x1x1x128xf32>
    tpu.vector_store %arg5[%c0_38, %c0_39, %c0_40, %c0_41], %47 {strides = array<i32>} : memref<1x1x1x128xf32, #tpu.memory_space<vmem>>, vector<1x1x1x128xf32>,
    %49 = arith.mulf %42, %42 : vector<128x128xf32>
    %cst_42 = arith.constant dense<0.000000e+00> : vector<128xf32>
    %50 = vector.multi_reduction <add>, %49, %cst_42 [0] : vector<128x128xf32> to vector<128xf32>
    %51 = vector.shape_cast %50 : vector<128xf32> to vector<1x128xf32>
    %52 = vector.shape_cast %51 : vector<1x128xf32> to vector<1x1x1x128xf32>
    %c0_43 = arith.constant 0 : index
    %c0_44 = arith.constant 0 : index
    %c0_45 = arith.constant 0 : index
    %c0_46 = arith.constant 0 : index
    %53 = vector.load %arg6[%c0_43, %c0_44, %c0_45, %c0_46] : memref<1x1x1x128xf32, #tpu.memory_space<vmem>>, vector<1x1x1x128xf32>
    tpu.vector_store %arg6[%c0_43, %c0_44, %c0_45, %c0_46], %52 {strides = array<i32>} : memref<1x1x1x128xf32, #tpu.memory_space<vmem>>, vector<1x1x1x128xf32>,
    return
  }
  func.func @transform_0(%arg0: i32, %arg1: i32) -> (i32, i32, i32, i32) {
    %c0_i32 = arith.constant 0 : i32
    %c0_i32_0 = arith.constant 0 : i32
    %c0_i32_1 = arith.constant 0 : i32
    %c0_i32_2 = arith.constant 0 : i32
    return %arg0, %c0_i32, %c0_i32_0, %c0_i32_1 : i32, i32, i32, i32
  }
  func.func @transform_1(%arg0: i32, %arg1: i32) -> (i32, i32, i32) {
    %c0_i32 = arith.constant 0 : i32
    %c0_i32_0 = arith.constant 0 : i32
    %c0_i32_1 = arith.constant 0 : i32
    %c0_i32_2 = arith.constant 0 : i32
    return %c0_i32, %c0_i32_0, %c0_i32_1 : i32, i32, i32
  }
  func.func @transform_2(%arg0: i32, %arg1: i32) -> (i32, i32, i32, i32) {
    %c0_i32 = arith.constant 0 : i32
    %c0_i32_0 = arith.constant 0 : i32
    %c0_i32_1 = arith.constant 0 : i32
    return %arg0, %arg1, %c0_i32, %c0_i32_0 : i32, i32, i32, i32
  }
  func.func @transform_3(%arg0: i32, %arg1: i32) -> (i32, i32, i32, i32) {
    %c0_i32 = arith.constant 0 : i32
    %c0_i32_0 = arith.constant 0 : i32
    %c0_i32_1 = arith.constant 0 : i32
    return %arg0, %arg1, %c0_i32, %c0_i32_0 : i32, i32, i32, i32
  }
  func.func @transform_4(%arg0: i32, %arg1: i32) -> (i32, i32, i32, i32) {
    %c0_i32 = arith.constant 0 : i32
    %c0_i32_0 = arith.constant 0 : i32
    %c0_i32_1 = arith.constant 0 : i32
    return %arg0, %arg1, %c0_i32, %c0_i32_0 : i32, i32, i32, i32
  }
}

</mosaic_0001>

<bundles_post_ra>
// kernel: double_conv.5
= control target key start
LH: loop header
LB: loop body
LE: loop exit
PB: predicated region body
PF: predicated region fallthrough
CT: control target
= control target key end

     0   :  { %s525_s12 = smov 0   ;;  %s527_s13 = smov 0   ;;  %s654_s0 = inlined_call_operand.vmem [shape: f32[2,16,16,128], index: 0, kind: input, shape index: {}]   ;;  %s655_s1 = inlined_call_operand.vmem [shape: f32[1,128], index: 1, kind: input, shape index: {}]   ;;  %s656_s2 = inlined_call_operand.vmem [shape: f32[1,128], index: 2, kind: input, shape index: {}]   ;;  %s657_s3 = inlined_call_operand.vmem [shape: f32[2,16,16,128], index: 3, kind: output, shape index: {}]  }
   0x1   :  { %s529_s14 = smov 0   ;;  %s531_s15 = smov 0  }
   0x2   :  { %s533_s16 = smov 0  }
   0x3 LB: > { %s22_s17 = sadd.s32 1, %s495_s14  ;;  %s25_s18 = sadd.s32 1, %s499_s15  ;;  %s503_s16 = sphi %s533_s16, %s13_s16   ;;  %s499_s15 = sphi %s531_s15, %s661_s15   ;;  %s495_s14 = sphi %s529_s14, %s660_s14   ;;  %s491_s13 = sphi %s527_s13, %s659_s13   ;;  %s487_s12 = sphi %s525_s12, %s658_s12  }
   0x4   : > { %p23_p0 = scmp.ge.s32.totalorder %s22_s17, 2  ;;  %p412_p1 = scmp.ge.s32.totalorder %s503_s16, 1 }
   0x5   : > { %p159_p2 = scmp.lt.s32.totalorder %s503_s16, 5 }
   0x6   : > { %s663_s17 = smov (%p23_p0, %s22_s17), 0  ;;  %s665_s18 = smov (!%p23_p0, %s25_s18), %s499_s15 }
   0x7   : > { %p160_p3 = pnand %p412_p1, %p159_p2  ;;  %p27_p4 = scmp.ge.s32.totalorder %s665_s18, 2 }
   0x8   : > { %s413_s19 = sshll.u32 (!%p160_p3), %s487_s12, 3  ;;  %p194_p5 = scmp.lt.s32.totalorder (!%p160_p3), %s491_s13, 1  ;;  %v558_v0 = vld [vmem:[%s655_s1] ss:$0 sm:$0xff] (!%p160_p3) }
   0x9   : > { %s667_s18 = smov (%p27_p4, %s665_s18), 0  ;;  %163 = sbr.rel (%p160_p3) target bundleno = 39 (0x27), region = 32 }
   0xa   : > { %p196_p6 = scmp.lt.s32.totalorder (!%p160_p3), %s413_s19, 15  ;;  %v568_v1 = vld [vmem:[%s656_s2] ss:$0 sm:$0xff] (!%p160_p3) }
  0x10   : > { %s669_s13 = smov (!%p194_p5, %s491_s13), 1  ;;  %s671_s19 = smov (!%p196_p6, %s413_s19), 15 }
  0x11   : > { %s415_s20 = sshll.u32 %s669_s13, 5  ;;  %s414_s21 = sshll.u32 %s671_s19, 1 }
  0x12   : > { %s200_s22 = sadd.s32 %s415_s20, %s414_s21 }
  0x13   : > { %s416_s23 = sshll.u32 %s200_s22, 3 }
  0x14   : > { %s563_s28 = scalar_lea.vmem %s654_s0, %s416_s23  ;;  %s591_s6 = scalar_lea.vmem %s657_s3, %s416_s23 }
  0x15   : > { %v217_v2 = vld [vmem:[%s563_s28] sm:$0xff]  ;;  %v218_v3 = vld [vmem:[%s563_s28 + $0x8] sm:$0xff]  ;;  %v219_v4 = vld [vmem:[%s563_s28 + $0x10] sm:$0xff] }
  0x16   : > { %v239_v5 = vmul.f32 %v558_v0, %v217_v2  ;;  %v240_v6 = vmul.f32 %v558_v0, %v218_v3  ;;  %v241_v7 = vmul.f32 %v558_v0, %v219_v4  ;;  %v220_v8 = vld [vmem:[%s563_s28 + $0x18] sm:$0xff]  ;;  %v221_v9 = vld [vmem:[%s563_s28 + $0x20] sm:$0xff]  ;;  %v222_v10 = vld [vmem:[%s563_s28 + $0x28] sm:$0xff] }
  0x17   : > { %v242_v11 = vmul.f32 %v558_v0, %v220_v8  ;;  %v243_v12 = vmul.f32 %v558_v0, %v221_v9  ;;  %v244_v13 = vmul.f32 %v558_v0, %v222_v10  ;;  %v223_v14 = vld [vmem:[%s563_s28 + $0x30] sm:$0xff]  ;;  %v224_v15 = vld [vmem:[%s563_s28 + $0x38] sm:$0xff]  ;;  %v225_v24 = vld [vmem:[%s563_s28 + $0x40] sm:$0xff] }
  0x18   : > { %v261_v16 = vadd.f32 %v568_v1, %v239_v5  ;;  %v262_v17 = vadd.f32 %v568_v1, %v240_v6  ;;  %v263_v18 = vadd.f32 %v568_v1, %v241_v7  ;;  %v245_v19 = vmul.f32 %v558_v0, %v223_v14  ;;  %v226_v25 = vld [vmem:[%s563_s28 + $0x48] sm:$0xff]  ;;  %v227_v26 = vld [vmem:[%s563_s28 + $0x50] sm:$0xff]  ;;  %v228_v31 = vld [vmem:[%s563_s28 + $0x58] sm:$0xff] }
  0x19   : > { %v264_v20 = vadd.f32 %v568_v1, %v242_v11  ;;  %v265_v21 = vadd.f32 %v568_v1, %v243_v12  ;;  %v266_v22 = vadd.f32 %v568_v1, %v244_v13  ;;  %v246_v23 = vmul.f32 %v558_v0, %v224_v15  ;;  %v229_v32 = vld [vmem:[%s563_s28 + $0x60] sm:$0xff]  ;;  %v230_v33 = vld [vmem:[%s563_s28 + $0x68] sm:$0xff]  ;;  %v231_v38 = vld [vmem:[%s563_s28 + $0x70] sm:$0xff] }
  0x1a   : > { %v277_v27 = vmax.f32 %v261_v16, 0.0  ;;  %v278_v28 = vmax.f32 %v262_v17, 0.0  ;;  %v279_v29 = vmax.f32 %v263_v18, 0.0  ;;  %v267_v30 = vadd.f32 %v568_v1, %v245_v19  ;;  %v232_v43 = vld [vmem:[%s563_s28 + $0x78] sm:$0xff] }
  0x1b   : > { %v280_v34 = vmax.f32 %v264_v20, 0.0  ;;  %v281_v35 = vmax.f32 %v265_v21, 0.0  ;;  %v282_v36 = vmax.f32 %v266_v22, 0.0  ;;  %v268_v37 = vadd.f32 %v568_v1, %v246_v23 }
  0x1c   : > { %293 = vst [vmem:[%s591_s6] sm:$0xff] %v277_v27  ;;  %294 = vst [vmem:[%s591_s6 + $0x8] sm:$0xff] %v278_v28  ;;  %v283_v39 = vmax.f32 %v267_v30, 0.0  ;;  %v247_v40 = vmul.f32 %v558_v0, %v225_v24  ;;  %v248_v41 = vmul.f32 %v558_v0, %v226_v25  ;;  %v249_v42 = vmul.f32 %v558_v0, %v227_v26 }
  0x1d   : > { %295 = vst [vmem:[%s591_s6 + $0x10] sm:$0xff] %v279_v29  ;;  %296 = vst [vmem:[%s591_s6 + $0x18] sm:$0xff] %v280_v34  ;;  %v284_v44 = vmax.f32 %v268_v37, 0.0  ;;  %v250_v45 = vmul.f32 %v558_v0, %v228_v31  ;;  %v251_v46 = vmul.f32 %v558_v0, %v229_v32  ;;  %v252_v47 = vmul.f32 %v558_v0, %v230_v33 }
  0x1e   : > { %297 = vst [vmem:[%s591_s6 + $0x20] sm:$0xff] %v281_v35  ;;  %298 = vst [vmem:[%s591_s6 + $0x28] sm:$0xff] %v282_v36  ;;  %v269_v48 = vadd.f32 %v568_v1, %v247_v40  ;;  %v270_v49 = vadd.f32 %v568_v1, %v248_v41  ;;  %v271_v50 = vadd.f32 %v568_v1, %v249_v42 }
  0x1f   : > { %299 = vst [vmem:[%s591_s6 + $0x30] sm:$0xff] %v283_v39  ;;  %v253_v51 = vmul.f32 %v558_v0, %v231_v38  ;;  %300 = vst [vmem:[%s591_s6 + $0x38] sm:$0xff] %v284_v44  ;;  %v272_v52 = vadd.f32 %v568_v1, %v250_v45  ;;  %v273_v53 = vadd.f32 %v568_v1, %v251_v46 }
  0x20   : > { %v274_v54 = vadd.f32 %v568_v1, %v252_v47  ;;  %v254_v55 = vmul.f32 %v558_v0, %v232_v43  ;;  %v285_v56 = vmax.f32 %v269_v48, 0.0  ;;  %v286_v57 = vmax.f32 %v270_v49, 0.0 }
  0x21   : > { %v287_v58 = vmax.f32 %v271_v50, 0.0  ;;  %v275_v59 = vadd.f32 %v568_v1, %v253_v51  ;;  %v288_v60 = vmax.f32 %v272_v52, 0.0  ;;  %v289_v61 = vmax.f32 %v273_v53, 0.0 }
  0x22   : > { %v290_v62 = vmax.f32 %v274_v54, 0.0  ;;  %v276_v63 = vadd.f32 %v568_v1, %v254_v55  ;;  %301 = vst [vmem:[%s591_s6 + $0x40] sm:$0xff] %v285_v56  ;;  %302 = vst [vmem:[%s591_s6 + $0x48] sm:$0xff] %v286_v57 }
  0x23   : > { %303 = vst [vmem:[%s591_s6 + $0x50] sm:$0xff] %v287_v58  ;;  %v291_v2 = vmax.f32 %v275_v59, 0.0  ;;  %304 = vst [vmem:[%s591_s6 + $0x58] sm:$0xff] %v288_v60 }
  0x24   : > { %305 = vst [vmem:[%s591_s6 + $0x60] sm:$0xff] %v289_v61  ;;  %306 = vst [vmem:[%s591_s6 + $0x68] sm:$0xff] %v290_v62  ;;  %v292_v0 = vmax.f32 %v276_v63, 0.0 }
  0x25   : > { %307 = vst [vmem:[%s591_s6 + $0x70] sm:$0xff] %v291_v2 }
  0x26   : > { %308 = vst [vmem:[%s591_s6 + $0x78] sm:$0xff] %v292_v0 }
  0x27 PF: > { %s13_s16 = sadd.s32 1, %s503_s16   ;;  %s658_s12 = smov %s495_s14 }
  0x28   : > { %p10_p7 = scmp.ge.s32.totalorder %s13_s16, 6   ;;  %s659_s13 = smov %s499_s15 }
  0x29   : > { %s660_s14 = smov %s663_s17  ;;  %s661_s15 = smov %s667_s18 }
  0x2a   :  { %12 = sbr.rel (!%p10_p7) target bundleno = 3 (0x3), region = 62 }

// kernel: double_conv.4
= control target key start
LH: loop header
LB: loop body
LE: loop exit
PB: predicated region body
PF: predicated region fallthrough
CT: control target
= control target key end

     0   :  { %s2676_s15 = smov 0   ;;  %s2678_s16 = smov 0   ;;  %s3038_s0 = inlined_call_operand.vmem [shape: f32[2,18,18,4], index: 0, kind: input, shape index: {}]   ;;  %s3039_s1 = inlined_call_operand.vmem [shape: bf16[9,4,128], index: 1, kind: input, shape index: {}]   ;;  %s3040_s2 = inlined_call_operand.vmem [shape: f32[2,16,16,128], index: 2, kind: output, shape index: {0}]   ;;  %s3041_s3 = inlined_call_operand.vmem [shape: f32[2,2,1,128], index: 3, kind: output, shape index: {1}]   ;;  %s3042_s4 = inlined_call_operand.vmem [shape: f32[2,2,1,128], index: 4, kind: output, shape index: {2}]  }
   0x1   :  { %s2680_s17 = smov 0   ;;  %s2682_s18 = smov 0  }
   0x2   :  { %s2684_s19 = smov 0  }
   0x3 LB: > { %s24_s20 = sadd.s32 1, %s2641_s17  ;;  %s27_s21 = sadd.s32 1, %s2645_s18  ;;  %s2649_s19 = sphi %s2684_s19, %s15_s19   ;;  %s2645_s18 = sphi %s2682_s18, %s3046_s18   ;;  %s2641_s17 = sphi %s2680_s17, %s3045_s17   ;;  %s2637_s16 = sphi %s2678_s16, %s3044_s16   ;;  %s2633_s15 = sphi %s2676_s15, %s3043_s15  }
   0x4   : > { %p25_p0 = scmp.ge.s32.totalorder %s24_s20, 2  ;;  %p1995_p1 = scmp.ge.s32.totalorder %s2649_s19, 1 }
   0x5   : > { %p185_p2 = scmp.lt.s32.totalorder %s2649_s19, 5 }
   0x6   : > { %s3048_s20 = smov (%p25_p0, %s24_s20), 0  ;;  %s3050_s21 = smov (!%p25_p0, %s27_s21), %s2645_s18 }
   0x7   : > { %p186_p3 = pnand %p1995_p1, %p185_p2  ;;  %p29_p4 = scmp.ge.s32.totalorder %s3050_s21, 2 }
   0x8   : > { %v2105_v0 = vld [vmem:[%s3039_s1 + $0x2] sm:$0x3] (!%p186_p3)  ;;  %vm514_vm0 = vcmask (!%p186_p3), 1041408   ;;  %v2714_v1 = vld [vmem:[%s3039_s1 + $0x8] sm:$0x3] (!%p186_p3)  ;;  %p230_p5 = scmp.lt.s32.totalorder (!%p186_p3), %s2637_s16, 1 }
   0x9   : > { %s3052_s21 = smov (%p29_p4, %s3050_s21), 0  ;;  %189 = sbr.rel (%p186_p3) target bundleno = 400 (0x190), region = 28 }
   0xa   : > { %2560 = vmatprep.subr.msk.bf16.mxu1 (!%p186_p3), %vm514_vm0, %v2105_v0  ;;  %2564 = vmatprep.subr.msk.bf16.mxu0 (!%p186_p3), %vm514_vm0, %v2714_v1  ;;  %v516_v2 = vsel (!%p186_p3), %vm514_vm0, %v2105_v0, 0  ;;  %v2722_v3 = vsel (!%p186_p3), %vm514_vm0, %v2714_v1, 0  ;;  %v486_v4 = vld [vmem:[%s3039_s1] sm:$0x3] (!%p186_p3)  ;;  %v2149_v5 = vld [vmem:[%s3039_s1 + $0xa] sm:$0x3] (!%p186_p3) }
   0xb   : > { %2269 = vmatpush3.bf16.msra.mxu1 (!%p186_p3), %v516_v2  ;;  %2341 = vmatpush3.bf16.msra.mxu0 (!%p186_p3), %v2722_v3  ;;  %s2004_s30 = smul.u32 (!%p186_p3), 192, %s2633_s15  ;;  %vm489_vm1 = vcmask (!%p186_p3), 31744   ;;  %v640_v14 = vsel (!%p186_p3), %vm514_vm0, %v486_v4, 0  ;;  %v1192_v18 = vsel (!%p186_p3), %vm514_vm0, %v2149_v5, 0  ;;  %v2158_v20 = vld [vmem:[%s3039_s1 + $0xc] sm:$0x3] (!%p186_p3) }
   0xc   : > { %2561 = vmatprep.subr.msk.bf16.mxu1 (!%p186_p3), %vm514_vm0, %v486_v4  ;;  %2566 = vmatprep.subr.msk.bf16.mxu0 (!%p186_p3), %vm514_vm0, %v2149_v5  ;;  %v2122_v21 = vld [vmem:[%s3039_s1 + $0x4] sm:$0x3] (!%p186_p3)  ;;  %v1334_v40 = vsel (!%p186_p3), %vm514_vm0, %v2158_v20, 0  ;;  %v2167_v41 = vld [vmem:[%s3039_s1 + $0xe] sm:$0x3] (!%p186_p3)  ;;  %s1997_s27 = sshll.u32 (!%p186_p3), %s2633_s15, 3 }
   0xd   : > { %v766_v0 = vsel (!%p186_p3), %vm514_vm0, %v2122_v21, 0  ;;  %v2131_v5 = vld [vmem:[%s3039_s1 + $0x6] sm:$0x3] (!%p186_p3)  ;;  %p238_p6 = scmp.lt.s32.totalorder (!%p186_p3), %s1997_s27, 15  ;;  %p248_p7 = scmp.lt.s32.totalorder (!%p186_p3), %s2633_s15, 1 }
  0x10   : > { %s3054_s16 = smov (!%p230_p5, %s2637_s16), 1  ;;  %s3056_s27 = smov (!%p238_p6, %s1997_s27), 15 }
  0x11   : > { %s2570_s5 = smul.u32 432, %s3054_s16  ;;  %s1998_s28 = sshll.u32 %s3056_s27, 1 }
  0x12   : > { %s1999_s29 = sshll.u32 %s3054_s16, 5  ;;  %s3058_s15 = smov (!%p248_p7, %s2633_s15), 1 }
  0x13   : > { %s234_s8 = scalar_lea.vmem %s3038_s0, %s2570_s5 }
  0x14   : > { %s2740_s9 = scalar_lea.vmem %s234_s8, %s2004_s30  ;;  %s242_s30 = sadd.s32 %s1999_s29, %s1998_s28 }
  0x15   : > { %v288_v6 = vld [vmem:[%s2740_s9 + $0x1] sm:$0xff]  ;;  %v289_v7 = vld [vmem:[%s2740_s9 + $0x9] sm:$0xff]  ;;  %v2023_v8 = vld [vmem:[%s2740_s9 + $0x19] sm:$0xff]  ;;  %s2000_s5 = sshll.u32 %s242_s30, 3 }
  0x16   : > { %v304_v9 = vpack.c.bf16 %v289_v7, %v288_v6  ;;  %v2024_v10 = vld [vmem:[%s2740_s9 + $0x21] sm:$0xff]  ;;  %v2025_v11 = vld [vmem:[%s2740_s9 + $0x31] sm:$0xff]  ;;  %v2026_v12 = vld [vmem:[%s2740_s9 + $0x39] sm:$0xff]  ;;  %s2996_s8 = scalar_lea.vmem %s3040_s2, %s2000_s5 }
  0x17   : > { %v379_v13 = vpack.c.bf16 %v2024_v10, %v2023_v8  ;;  %v2749_v15 = vpack.c.bf16 %v2026_v12, %v2025_v11  ;;  %v2027_v16 = vld [vmem:[%s2740_s9 + $0x49] sm:$0xff]  ;;  %v2028_v17 = vld [vmem:[%s2740_s9 + $0x51] sm:$0xff]  ;;  %v2029_v22 = vld [vmem:[%s2740_s9 + $0x61] sm:$0xff] }
  0x18   : > { %2270 = vmatprep.mubr.msk.bf16.mxu1 %vm489_vm1, %v304_v9  ;;  %v2755_v19 = vpack.c.bf16 %v2028_v17, %v2027_v16  ;;  %v2030_v23 = vld [vmem:[%s2740_s9 + $0x69] sm:$0xff]  ;;  %v2039_v24 = vld [vmem:[%s2740_s9 + $0x1a] sm:$0xff]  ;;  %v2041_v30 = vld [vmem:[%s2740_s9 + $0x32] sm:$0xff] }
  0x19   : > { %2342 = vmatprep.mubr.msk.bf16.mxu0 %vm489_vm1, %v379_v13  ;;  %2271 = vmatmul.mubr.msk.bf16.vlgmr.msra.gmra.mrb[0].mxu1 %vm489_vm1, %v379_v13  ;;  %v2040_v25 = vld [vmem:[%s2740_s9 + $0x22] sm:$0xff]  ;;  %v2777_v26 = vpack.c.bf16 %v2030_v23, %v2029_v22  ;;  %v298_v28 = vld [vmem:[%s2740_s9 + $0x79] sm:$0xff]  ;;  %v300_v32 = vld [vmem:[%s2740_s9 + $0x91] sm:$0xff]  ;;  %v1476_v23 = vsel %vm514_vm0, %v2167_v41, 0 }
  0x1a   : > { %2287 = vmatpush3.bf16.msra.mxu1 %v640_v14  ;;  %2343 = vmatmul.mubr.msk.bf16.vlgmr.msra.gmra.mrb[0].mxu0 %vm489_vm1, %v2749_v15  ;;  %v2779_v27 = vpack.c.bf16 %v2040_v25, %v2039_v24  ;;  %v299_v29 = vld [vmem:[%s2740_s9 + $0x81] sm:$0xff]  ;;  %v301_v33 = vld [vmem:[%s2740_s9 + $0x99] sm:$0xff]  ;;  %v2043_v34 = vld [vmem:[%s2740_s9 + $0x4a] sm:$0xff] }
  0x1b   : > { %2359 = vmatpush3.bf16.msra.mxu0 %v1192_v18  ;;  %2274 = vmatprep.mubr.msk.bf16.mxu1 %vm489_vm1, %v2749_v15  ;;  %v2042_v31 = vld [vmem:[%s2740_s9 + $0x3a] sm:$0xff]  ;;  %v2044_v35 = vld [vmem:[%s2740_s9 + $0x52] sm:$0xff]  ;;  %v2797_v36 = vpack.c.bf16 %v299_v29, %v298_v28  ;;  %v2801_v38 = vpack.c.bf16 %v301_v33, %v300_v32  ;;  %v302_v42 = vld [vmem:[%s2740_s9 + $0xa9] sm:$0xff] }
  0x1c   : > { %2346 = vmatprep.mubr.msk.bf16.mxu0 %vm489_vm1, %v2755_v19  ;;  %2567 = vmatprep.subr.msk.bf16.mxu0 %vm514_vm0, %v2158_v20  ;;  %v2799_v37 = vpack.c.bf16 %v2042_v31, %v2041_v30  ;;  %v2803_v39 = vpack.c.bf16 %v2044_v35, %v2043_v34  ;;  %v303_v43 = vld [vmem:[%s2740_s9 + $0xb1] sm:$0xff]  ;;  %v2045_v44 = vld [vmem:[%s2740_s9 + $0x62] sm:$0xff]  ;;  %v2047_v48 = vld [vmem:[%s2740_s9 + $0x7a] sm:$0xff]  ;;  %v908_v35 = vsel %vm514_vm0, %v2131_v5, 0 }
  0x1d   : > { %2562 = vmatprep.subr.msk.bf16.mxu1 %vm514_vm0, %v2122_v21  ;;  %v2046_v45 = vld [vmem:[%s2740_s9 + $0x6a] sm:$0xff]  ;;  %v264_v46 = vld [vmem:[%s2740_s9] sm:$0xff]  ;;  %v2826_v50 = vpack.c.bf16 %v303_v43, %v302_v42  ;;  %v266_v54 = vld [vmem:[%s2740_s9 + $0x18] sm:$0xff] }
  0x1e   : > { %v265_v47 = vld [vmem:[%s2740_s9 + $0x8] sm:$0xff]  ;;  %v2828_v51 = vpack.c.bf16 %v2046_v45, %v2045_v44  ;;  %v267_v55 = vld [vmem:[%s2740_s9 + $0x20] sm:$0xff]  ;;  %v2049_v56 = vld [vmem:[%s2740_s9 + $0x92] sm:$0xff] }
  0x1f   : > { %v2048_v49 = vld [vmem:[%s2740_s9 + $0x82] sm:$0xff]  ;;  %v280_v52 = vpack.c.bf16 %v265_v47, %v264_v46  ;;  %v2050_v57 = vld [vmem:[%s2740_s9 + $0x9a] sm:$0xff]  ;;  %v268_v58 = vld [vmem:[%s2740_s9 + $0x30] sm:$0xff]  ;;  %v2847_v62 = vpack.c.bf16 %v267_v55, %v266_v54 }
  0x20   : > { %v2830_v53 = vpack.c.bf16 %v2048_v49, %v2047_v48  ;;  %v269_v59 = vld [vmem:[%s2740_s9 + $0x38] sm:$0xff]  ;;  %v2051_v60 = vld [vmem:[%s2740_s9 + $0xaa] sm:$0xff]  ;;  %v2849_v63 = vpack.c.bf16 %v2050_v57, %v2049_v56  ;;  %v2053_v8 = vld [vmem:[%s2740_s9 + $0xc2] sm:$0xff] }
  0x21   : > { %2275 = vmatmul.mubr.msk.bf16.gmra.mrb[4].mxu1 %vm489_vm1, %v2755_v19  ;;  %v2052_v61 = vld [vmem:[%s2740_s9 + $0xb2] sm:$0xff]  ;;  %v2852_v2 = vpack.c.bf16 %v269_v59, %v268_v58  ;;  %v270_v6 = vld [vmem:[%s2740_s9 + $0x48] sm:$0xff]  ;;  %v272_v10 = vld [vmem:[%s2740_s9 + $0x60] sm:$0xff] }
  0x22   : > { %2347 = vmatmul.mubr.msk.bf16.gmra.mrb[4].mxu0 %vm489_vm1, %v2777_v26  ;;  %2278 = vmatprep.mubr.msk.bf16.mxu1 %vm489_vm1, %v2777_v26  ;;  %v2854_v4 = vpack.c.bf16 %v2052_v61, %v2051_v60  ;;  %v271_v7 = vld [vmem:[%s2740_s9 + $0x50] sm:$0xff]  ;;  %v273_v11 = vld [vmem:[%s2740_s9 + $0x68] sm:$0xff]  ;;  %v274_v16 = vld [vmem:[%s2740_s9 + $0x78] sm:$0xff] }
  0x23   : > { %2360 = vmatprep.mubr.msk.bf16.mxu0 %vm489_vm1, %v2779_v27  ;;  %v2054_v9 = vld [vmem:[%s2740_s9 + $0xca] sm:$0xff]  ;;  %v2874_v12 = vpack.c.bf16 %v271_v7, %v270_v6  ;;  %v2878_v14 = vpack.c.bf16 %v273_v11, %v272_v10  ;;  %v275_v17 = vld [vmem:[%s2740_s9 + $0x80] sm:$0xff]  ;;  %v277_v20 = vld [vmem:[%s2740_s9 + $0x98] sm:$0xff] }
  0x24   : > { %v2876_v13 = vpack.c.bf16 %v2054_v9, %v2053_v8  ;;  %v276_v18 = vld [vmem:[%s2740_s9 + $0x90] sm:$0xff]  ;;  %v285_v21 = vpack.c.bf16 %v275_v17, %v274_v16  ;;  %v278_v25 = vld [vmem:[%s2740_s9 + $0xa8] sm:$0xff]  ;;  %v2069_v33 = vld [vmem:[%s2740_s9 + $0xc0] sm:$0xff] }
  0x25   : > { %v286_v22 = vpack.c.bf16 %v277_v20, %v276_v18  ;;  %v2176_v24 = vld [vmem:[%s3039_s1 + $0x10] sm:$0x3]  ;;  %v312_v29 = vld [vmem:[%s2740_s9 + $0x2] sm:$0xff] }
  0x26   : > { %v279_v28 = vld [vmem:[%s2740_s9 + $0xb0] sm:$0xff]  ;;  %v2070_v34 = vld [vmem:[%s2740_s9 + $0xc8] sm:$0xff]  ;;  %v2072_v42 = vld [vmem:[%s2740_s9 + $0xe0] sm:$0xff] }
  0x27   : > { %v313_v30 = vld [vmem:[%s2740_s9 + $0xa] sm:$0xff]  ;;  %v287_v31 = vpack.c.bf16 %v279_v28, %v278_v25  ;;  %v2088_v44 = vld [vmem:[%s2740_s9 + $0xe1] sm:$0xff] }
  0x28   : > { %v328_v32 = vpack.c.bf16 %v313_v30, %v312_v29 }
  0x29   : > { %2279 = vmatmul.mubr.msk.bf16.gmra.mrb[8].mxu1 %vm489_vm1, %v2797_v36 }
  0x2a   : > { %2361 = vmatmul.mubr.msk.bf16.vlgmr.msra.gmra.mrb[0].mxu0 %vm489_vm1, %v2799_v37  ;;  %2282 = vmatprep.mubr.msk.bf16.mxu1 %vm489_vm1, %v2801_v38 }
  0x2b   : > { %2377 = vmatpush3.bf16.msra.mxu0 %v1334_v40  ;;  %2364 = vmatprep.mubr.msk.bf16.mxu0 %vm489_vm1, %v2803_v39  ;;  %v436_v40 = vpack.c.bf16 %v2070_v34, %v2069_v33 }
  0x2c   : > { %2568 = vmatprep.subr.msk.bf16.mxu0 %vm514_vm0, %v2167_v41  ;;  %v2071_v41 = vld [vmem:[%s2740_s9 + $0xd8] sm:$0xff] }
  0x2d   : > { %v437_v43 = vpack.c.bf16 %v2072_v42, %v2071_v41 }
  0x31   : > { %2283 = vmatmul.mubr.msk.bf16.gmra.mrb[12].mxu1 %vm489_vm1, %v2826_v50 }
  0x32   : > { %2365 = vmatmul.mubr.msk.bf16.gmra.mrb[4].mxu0 %vm489_vm1, %v2828_v51  ;;  %2288 = vmatprep.mubr.msk.bf16.mxu1 %vm489_vm1, %v280_v52 }
  0x33   : > { %2368 = vmatprep.mubr.msk.bf16.mxu0 %vm489_vm1, %v2830_v53 }
  0x39   : > { %2289 = vmatmul.mubr.msk.bf16.vlgmr.msra.gmra.mrb[0].mxu1 %vm489_vm1, %v2847_v62 }
  0x3a   : > { %2305 = vmatpush3.bf16.msra.mxu1 %v766_v0  ;;  %2369 = vmatmul.mubr.msk.bf16.gmra.mrb[8].mxu0 %vm489_vm1, %v2849_v63 }
  0x3b   : > { %2292 = vmatprep.mubr.msk.bf16.mxu1 %vm489_vm1, %v2852_v2  ;;  %2372 = vmatprep.mubr.msk.bf16.mxu0 %vm489_vm1, %v2854_v4 }
  0x3c   : > { %2563 = vmatprep.subr.msk.bf16.mxu1 %vm514_vm0, %v2131_v5 }
  0x41   : > { %2293 = vmatmul.mubr.msk.bf16.gmra.mrb[4].mxu1 %vm489_vm1, %v2874_v12 }
  0x42   : > { %2373 = vmatmul.mubr.msk.bf16.gmra.mrb[12].mxu0 %vm489_vm1, %v2876_v13  ;;  %2296 = vmatprep.mubr.msk.bf16.mxu1 %vm489_vm1, %v2878_v14 }
  0x43   : > { %2378 = vmatprep.mubr.msk.bf16.mxu0 %vm489_vm1, %v2852_v2 }
  0x49   : > { %2297 = vmatmul.mubr.msk.bf16.gmra.mrb[8].mxu1 %vm489_vm1, %v285_v21 }
  0x4a   : > { %2379 = vmatmul.mubr.msk.bf16.vlgmr.msra.gmra.mrb[0].mxu0 %vm489_vm1, %v2874_v12  ;;  %2300 = vmatprep.mubr.msk.bf16.mxu1 %vm489_vm1, %v286_v22 }
  0x4b   : > { %2395 = vmatpush3.bf16.msra.mxu0 %v1476_v23  ;;  %2382 = vmatprep.mubr.msk.bf16.mxu0 %vm489_vm1, %v2878_v14 }
  0x4c   : > { %2569 = vmatprep.subr.msk.bf16.mxu0 %vm514_vm0, %v2176_v24 }
  0x51   : > { %2301 = vmatmul.mubr.msk.bf16.gmra.mrb[12].mxu1 %vm489_vm1, %v287_v31 }
  0x52   : > { %2383 = vmatmul.mubr.msk.bf16.gmra.mrb[4].mxu0 %vm489_vm1, %v285_v21  ;;  %2306 = vmatprep.mubr.msk.bf16.mxu1 %vm489_vm1, %v328_v32 }
  0x53   : > { %2386 = vmatprep.mubr.msk.bf16.mxu0 %vm489_vm1, %v286_v22 }
  0x59   : > { %2307 = vmatmul.mubr.msk.bf16.vlgmr.msra.gmra.mrb[0].mxu1 %vm489_vm1, %v2779_v27  ;;  %v1618_v27 = vsel %vm514_vm0, %v2176_v24, 0 }
  0x5a   : > { %2323 = vmatpush3.bf16.msra.mxu1 %v908_v35  ;;  %2387 = vmatmul.mubr.msk.bf16.gmra.mrb[8].mxu0 %vm489_vm1, %v287_v31 }
  0x5b   : > { %2310 = vmatprep.mubr.msk.bf16.mxu1 %vm489_vm1, %v2799_v37  ;;  %2390 = vmatprep.mubr.msk.bf16.mxu0 %vm489_vm1, %v436_v40 }
  0x5c   : > { %2565 = vmatprep.subr.msk.bf16.mxu1 %vm514_vm0, %v2714_v1  ;;  %v2085_v1 = vld [vmem:[%s2740_s9 + $0xc1] sm:$0xff] }
  0x61   : > { %2311 = vmatmul.mubr.msk.bf16.gmra.mrb[4].mxu1 %vm489_vm1, %v2803_v39 }
  0x62   : > { %2391 = vmatmul.mubr.msk.bf16.gmra.mrb[12].mxu0 %vm489_vm1, %v437_v43  ;;  %2314 = vmatprep.mubr.msk.bf16.mxu1 %vm489_vm1, %v2828_v51 }
  0x63   : > { %2396 = vmatprep.mubr.msk.bf16.mxu0 %vm489_vm1, %v2749_v15  ;;  %v2086_v15 = vld [vmem:[%s2740_s9 + $0xc9] sm:$0xff] }
  0x69   : > { %2315 = vmatmul.mubr.msk.bf16.gmra.mrb[8].mxu1 %vm489_vm1, %v2830_v53 }
  0x6a   : > { %2397 = vmatmul.mubr.msk.bf16.vlgmr.msra.gmra.mrb[0].mxu0 %vm489_vm1, %v2755_v19  ;;  %2318 = vmatprep.mubr.msk.bf16.mxu1 %vm489_vm1, %v2849_v63  ;;  %v460_v19 = vpack.c.bf16 %v2086_v15, %v2085_v1 }
  0x6b   : > { %2413 = vmatpush3.bf16.msra.mxu0 %v1618_v27  ;;  %2400 = vmatprep.mubr.msk.bf16.mxu0 %vm489_vm1, %v2777_v26  ;;  %v2087_v26 = vld [vmem:[%s2740_s9 + $0xd9] sm:$0xff] }
  0x6c   : > { %v461_v45 = vpack.c.bf16 %v2088_v44, %v2087_v26 }
  0x71   : > { %2319 = vmatmul.mubr.msk.bf16.gmra.mrb[12].mxu1 %vm489_vm1, %v2854_v4 }
  0x72   : > { %2401 = vmatmul.mubr.msk.bf16.gmra.mrb[4].mxu0 %vm489_vm1, %v2797_v36  ;;  %2324 = vmatprep.mubr.msk.bf16.mxu1 %vm489_vm1, %v2847_v62 }
  0x73   : > { %2404 = vmatprep.mubr.msk.bf16.mxu0 %vm489_vm1, %v2801_v38 }
  0x79   : > { %2325 = vmatmul.mubr.msk.bf16.vlgmr.msra.gmra.mrb[0].mxu1 %vm489_vm1, %v2852_v2 }
  0x7a   : > { %2431 = vmatpush3.bf16.msra.mxu1 %v2722_v3  ;;  %2405 = vmatmul.mubr.msk.bf16.gmra.mrb[8].mxu0 %vm489_vm1, %v2826_v50  ;;  %v2103_v3 = vld [vmem:[%s2740_s9 + $0xda] sm:$0xff] }
  0x7b   : > { %2328 = vmatprep.mubr.msk.bf16.mxu1 %vm489_vm1, %v2874_v12  ;;  %2408 = vmatprep.mubr.msk.bf16.mxu0 %vm489_vm1, %v460_v19 }
  0x81   : > { %2329 = vmatmul.mubr.msk.bf16.gmra.mrb[4].mxu1 %vm489_vm1, %v2878_v14 }
  0x82   : > { %2409 = vmatmul.mubr.msk.bf16.gmra.mrb[12].mxu0 %vm489_vm1, %v461_v45  ;;  %2332 = vmatprep.mubr.msk.bf16.mxu1 %vm489_vm1, %v285_v21 }
  0x83   : > { %2414 = vmatprep.mubr.msk.bf16.mxu0 %vm489_vm1, %v2799_v37  ;;  %v2104_v37 = vld [vmem:[%s2740_s9 + $0xe2] sm:$0xff]  ;;  %s2001_s9 = sshll.u32 %s3054_s16, 1 }
  0x84   : > { %s251_s10 = sadd.s32 %s2001_s9, %s3058_s15 }
  0x85   : > { %s252_s13 = scalar_lea.vmem %s3041_s3, %s251_s10  ;;  %s259_s23 = scalar_lea.vmem %s3042_s4, %s251_s10 }
  0x89   : > { %2333 = vmatmul.mubr.msk.bf16.gmra.mrb[8].mxu1 %vm489_vm1, %v286_v22 }
  0x8a   : > { %2415 = vmatmul.mubr.msk.bf16.vlgmr.msra.gmra.mrb[0].mxu0 %vm489_vm1, %v2803_v39  ;;  %2336 = vmatprep.mubr.msk.bf16.mxu1 %vm489_vm1, %v287_v31  ;;  %v485_v39 = vpack.c.bf16 %v2104_v37, %v2103_v3 }
  0x8b   : > { %2418 = vmatprep.mubr.msk.bf16.mxu0 %vm489_vm1, %v2828_v51 }
  0x91   : > { %2337 = vmatmul.mubr.msk.bf16.gmra.mrb[12].mxu1 %vm489_vm1, %v436_v40 }
  0x92   : > { %2419 = vmatmul.mubr.msk.bf16.gmra.mrb[4].mxu0 %vm489_vm1, %v2830_v53  ;;  %2350 = vmatprep.mubr.msk.bf16.mxu1 %vm489_vm1, %v2797_v36 }
  0x93   : > { %2422 = vmatprep.mubr.msk.bf16.mxu0 %vm489_vm1, %v2849_v63 }
  0x99   : > { %2351 = vmatmul.mubr.msk.bf16.vlgmr.msra.gmra.mrb[8].mxu1 %vm489_vm1, %v2801_v38 }
  0x9a   : > { %2423 = vmatmul.mubr.msk.bf16.gmra.mrb[8].mxu0 %vm489_vm1, %v2854_v4  ;;  %2354 = vmatprep.mubr.msk.bf16.mxu1 %vm489_vm1, %v2826_v50 }
  0x9b   : > { %2426 = vmatprep.mubr.msk.bf16.mxu0 %vm489_vm1, %v2876_v13 }
  0xa1   : > { %2355 = vmatmul.mubr.msk.bf16.gmra.mrb[12].mxu1 %vm489_vm1, %v460_v19 }
  0xa2   : > { %2427 = vmatmul.mubr.msk.bf16.gmra.mrb[12].mxu0 %vm489_vm1, %v485_v39 }
 0x14c   : > { %v2326_v36 = vpop.f32.mrb[0].mxu1 }
 0x14d   : > { %v944_v38 = vpop.f32.mrb[1].mxu1 }
 0x14e   : > { %v2327_v46 = vpop.f32.mrb[2].mxu1 }
 0x14f   : > { %v947_v47 = vpop.f32.mrb[3].mxu1 }
 0x154   : > { %v2330_v48 = vpop.f32.mrb[4].mxu1 }
 0x155   : > { %v960_v49 = vpop.f32.mrb[5].mxu1 }
 0x156   : > { %v2331_v50 = vpop.f32.mrb[6].mxu1 }
 0x157   : > { %v963_v51 = vpop.f32.mrb[7].mxu1 }
 0x15d   : > { %v2416_v52 = vpop.f32.mrb[0].mxu0 }
 0x15e   : > { %v2432_v53 = vadd.f32 %v2416_v52, %v2326_v36  ;;  %v1654_v54 = vpop.f32.mrb[1].mxu0 }
 0x15f   : > { %v2433_v55 = vadd.f32 %v1654_v54, %v944_v38  ;;  %v2417_v56 = vpop.f32.mrb[2].mxu0 }
 0x160   : > { %1735 = vst [vmem:[%s2996_s8 + $0x10] sm:$0xff] %v2432_v53  ;;  %v2434_v57 = vadd.f32 %v2417_v56, %v2327_v46  ;;  %v1657_v58 = vpop.f32.mrb[3].mxu0  ;;  %v1773_v63 = vmul.f32 %v2432_v53, %v2432_v53 }
 0x161   : > { %1733 = vst [vmem:[%s2996_s8] sm:$0xff] %v2433_v55  ;;  %v2435_v59 = vadd.f32 %v1657_v58, %v947_v47  ;;  %v1771_v60 = vmul.f32 %v2433_v55, %v2433_v55 }
 0x162   : > { %1736 = vst [vmem:[%s2996_s8 + $0x18] sm:$0xff] %v2434_v57  ;;  %v1774_v7 = vmul.f32 %v2434_v57, %v2434_v57 }
 0x163   : > { %1734 = vst [vmem:[%s2996_s8 + $0x8] sm:$0xff] %v2435_v59  ;;  %v1749_v61 = vadd.f32 %v2435_v59, %v2433_v55  ;;  %v1772_v62 = vmul.f32 %v2435_v59, %v2435_v59 }
 0x165   : > { %v1750_v0 = vadd.f32 %v2432_v53, %v1749_v61  ;;  %v1787_v2 = vadd.f32 %v1772_v62, %v1771_v60  ;;  %v2420_v4 = vpop.f32.mrb[4].mxu0 }
 0x166   : > { %v2436_v5 = vadd.f32 %v2420_v4, %v2330_v48  ;;  %v1670_v6 = vpop.f32.mrb[5].mxu0 }
 0x167   : > { %v1788_v8 = vadd.f32 %v1787_v2, %v1773_v63  ;;  %v2437_v9 = vadd.f32 %v1670_v6, %v960_v49  ;;  %v1751_v10 = vadd.f32 %v2434_v57, %v1750_v0  ;;  %v2421_v11 = vpop.f32.mrb[6].mxu0 }
 0x168   : > { %1739 = vst [vmem:[%s2996_s8 + $0x30] sm:$0xff] %v2436_v5  ;;  %v2438_v12 = vadd.f32 %v2421_v11, %v2331_v50  ;;  %v1673_v13 = vpop.f32.mrb[7].mxu0  ;;  %v1777_v24 = vmul.f32 %v2436_v5, %v2436_v5 }
 0x169   : > { %1737 = vst [vmem:[%s2996_s8 + $0x20] sm:$0xff] %v2437_v9  ;;  %v1752_v14 = vadd.f32 %v2437_v9, %v1751_v10  ;;  %v1775_v16 = vmul.f32 %v2437_v9, %v2437_v9  ;;  %v1789_v17 = vadd.f32 %v1788_v8, %v1774_v7  ;;  %v2439_v18 = vadd.f32 %v1673_v13, %v963_v51 }
 0x16a   : > { %1740 = vst [vmem:[%s2996_s8 + $0x38] sm:$0xff] %v2438_v12  ;;  %v1778_v34 = vmul.f32 %v2438_v12, %v2438_v12 }
 0x16b   : > { %v1790_v20 = vadd.f32 %v1789_v17, %v1775_v16  ;;  %1738 = vst [vmem:[%s2996_s8 + $0x28] sm:$0xff] %v2439_v18  ;;  %v1753_v21 = vadd.f32 %v2439_v18, %v1752_v14  ;;  %v1776_v22 = vmul.f32 %v2439_v18, %v2439_v18 }
 0x16c   : > { %v2352_v23 = vpop.f32.mrb[8].mxu1 }
 0x16d   : > { %v1754_v25 = vadd.f32 %v2436_v5, %v1753_v21  ;;  %v1791_v28 = vadd.f32 %v1790_v20, %v1776_v22  ;;  %v2424_v29 = vpop.f32.mrb[8].mxu0  ;;  %v1118_v30 = vpop.f32.mrb[9].mxu1 }
 0x16e   : > { %v2440_v31 = vadd.f32 %v2424_v29, %v2352_v23  ;;  %v1686_v32 = vpop.f32.mrb[9].mxu0  ;;  %v2353_v33 = vpop.f32.mrb[10].mxu1 }
 0x16f   : > { %v1792_v35 = vadd.f32 %v1791_v28, %v1777_v24  ;;  %v2441_v40 = vadd.f32 %v1686_v32, %v1118_v30  ;;  %v1755_v41 = vadd.f32 %v2438_v12, %v1754_v25  ;;  %v2425_v42 = vpop.f32.mrb[10].mxu0  ;;  %v1121_v43 = vpop.f32.mrb[11].mxu1 }
 0x170   : > { %1743 = vst [vmem:[%s2996_s8 + $0x50] sm:$0xff] %v2440_v31  ;;  %v2442_v27 = vadd.f32 %v2425_v42, %v2353_v33  ;;  %v1689_v1 = vpop.f32.mrb[11].mxu0  ;;  %v1781_v36 = vmul.f32 %v2440_v31, %v2440_v31 }
 0x171   : > { %1741 = vst [vmem:[%s2996_s8 + $0x40] sm:$0xff] %v2441_v40  ;;  %v1756_v15 = vadd.f32 %v2441_v40, %v1755_v41  ;;  %v1779_v19 = vmul.f32 %v2441_v40, %v2441_v40  ;;  %v1793_v26 = vadd.f32 %v1792_v35, %v1778_v34  ;;  %v2443_v44 = vadd.f32 %v1689_v1, %v1121_v43 }
 0x172   : > { %1744 = vst [vmem:[%s2996_s8 + $0x58] sm:$0xff] %v2442_v27  ;;  %v1782_v52 = vmul.f32 %v2442_v27, %v2442_v27 }
 0x173   : > { %v1794_v45 = vadd.f32 %v1793_v26, %v1779_v19  ;;  %1742 = vst [vmem:[%s2996_s8 + $0x48] sm:$0xff] %v2443_v44  ;;  %v1757_v3 = vadd.f32 %v2443_v44, %v1756_v15  ;;  %v1780_v37 = vmul.f32 %v2443_v44, %v2443_v44 }
 0x174   : > { %v2356_v39 = vpop.f32.mrb[12].mxu1 }
 0x175   : > { %v1758_v38 = vadd.f32 %v2440_v31, %v1757_v3  ;;  %v1795_v46 = vadd.f32 %v1794_v45, %v1780_v37  ;;  %v2428_v47 = vpop.f32.mrb[12].mxu0  ;;  %v1134_v48 = vpop.f32.mrb[13].mxu1 }
 0x176   : > { %v2444_v49 = vadd.f32 %v2428_v47, %v2356_v39  ;;  %v1702_v50 = vpop.f32.mrb[13].mxu0  ;;  %v2357_v51 = vpop.f32.mrb[14].mxu1 }
 0x177   : > { %v1796_v53 = vadd.f32 %v1795_v46, %v1781_v36  ;;  %v2445_v54 = vadd.f32 %v1702_v50, %v1134_v48  ;;  %v1759_v55 = vadd.f32 %v2442_v27, %v1758_v38  ;;  %v2429_v56 = vpop.f32.mrb[14].mxu0  ;;  %v1137_v57 = vpop.f32.mrb[15].mxu1 }
 0x178   : > { %1747 = vst [vmem:[%s2996_s8 + $0x70] sm:$0xff] %v2444_v49  ;;  %v2446_v58 = vadd.f32 %v2429_v56, %v2357_v51  ;;  %v1705_v59 = vpop.f32.mrb[15].mxu0  ;;  %v1785_v5 = vmul.f32 %v2444_v49, %v2444_v49 }
 0x179   : > { %1745 = vst [vmem:[%s2996_s8 + $0x60] sm:$0xff] %v2445_v54  ;;  %v1760_v60 = vadd.f32 %v2445_v54, %v1759_v55  ;;  %v1783_v61 = vmul.f32 %v2445_v54, %v2445_v54  ;;  %v1797_v62 = vadd.f32 %v1796_v53, %v1782_v52  ;;  %v2447_v63 = vadd.f32 %v1705_v59, %v1137_v57 }
 0x17a   : > { %1748 = vst [vmem:[%s2996_s8 + $0x78] sm:$0xff] %v2446_v58  ;;  %v1786_v8 = vmul.f32 %v2446_v58, %v2446_v58 }
 0x17b   : > { %v1798_v0 = vadd.f32 %v1797_v62, %v1783_v61  ;;  %1746 = vst [vmem:[%s2996_s8 + $0x68] sm:$0xff] %v2447_v63  ;;  %v1761_v2 = vadd.f32 %v2447_v63, %v1760_v60  ;;  %v1784_v4 = vmul.f32 %v2447_v63, %v2447_v63 }
 0x17d   : > { %v1762_v6 = vadd.f32 %v2444_v49, %v1761_v2  ;;  %v1799_v7 = vadd.f32 %v1798_v0, %v1784_v4 }
 0x17f   : > { %v1763_v9 = vadd.f32 %v2446_v58, %v1762_v6  ;;  %v1800_v10 = vadd.f32 %v1799_v7, %v1785_v5 }
 0x181   : > { %v1764_v11 = vrot.slane %v1763_v9, 4  ;;  %v1801_v12 = vadd.f32 %v1800_v10, %v1786_v8 }
 0x183   : > { %v1765_v13 = vadd.f32 %v1764_v11, %v1763_v9  ;;  %v1802_v14 = vrot.slane %v1801_v12, 4 }
 0x185   : > { %v1766_v16 = vrot.slane %v1765_v13, 2  ;;  %v1803_v17 = vadd.f32 %v1802_v14, %v1801_v12 }
 0x187   : > { %v1767_v18 = vadd.f32 %v1766_v16, %v1765_v13  ;;  %v1804_v20 = vrot.slane %v1803_v17, 2 }
 0x189   : > { %v1768_v21 = vrot.slane %v1767_v18, 1  ;;  %v1805_v22 = vadd.f32 %v1804_v20, %v1803_v17 }
 0x18b   : > { %v1769_v23 = vadd.f32 %v1768_v21, %v1767_v18  ;;  %v1806_v24 = vrot.slane %v1805_v22, 1 }
 0x18d   : > { %1770 = vst [vmem:[%s252_s13] sm:$0x1] %v1769_v23  ;;  %v1807_v25 = vadd.f32 %v1806_v24, %v1805_v22 }
 0x18f   : > { %1808 = vst [vmem:[%s259_s23] sm:$0x1] %v1807_v25 }
 0x190 PF: > { %s15_s19 = sadd.s32 1, %s2649_s19   ;;  %s3043_s15 = smov %s2641_s17 }
 0x191   : > { %p12_p8 = scmp.ge.s32.totalorder %s15_s19, 6   ;;  %s3044_s16 = smov %s2645_s18 }
 0x192   : > { %s3045_s17 = smov %s3048_s20  ;;  %s3046_s18 = smov %s3052_s21 }
 0x193   :  { %14 = sbr.rel (!%p12_p8) target bundleno = 3 (0x3), region = 93 }

// kernel: double_conv.6
= control target key start
LH: loop header
LB: loop body
LE: loop exit
PB: predicated region body
PF: predicated region fallthrough
CT: control target
= control target key end

     0   :  { %s2491_s15 = smov 0   ;;  %s2493_s16 = smov 0   ;;  %s3057_s0 = inlined_call_operand.vmem [shape: f32[2,18,18,128], index: 0, kind: input, shape index: {}]   ;;  %s3058_s1 = inlined_call_operand.vmem [shape: bf16[9,128,128], index: 1, kind: input, shape index: {}]   ;;  %s3059_s2 = inlined_call_operand.vmem [shape: f32[2,16,16,128], index: 2, kind: output, shape index: {0}]   ;;  %s3060_s3 = inlined_call_operand.vmem [shape: f32[2,2,1,128], index: 3, kind: output, shape index: {1}]   ;;  %s3061_s4 = inlined_call_operand.vmem [shape: f32[2,2,1,128], index: 4, kind: output, shape index: {2}]  }
   0x1   :  { %s2495_s17 = smov 0   ;;  %s2497_s18 = smov 0  }
   0x2   :  { %s2499_s19 = smov 0  }
   0x3 LB: > { %s24_s20 = sadd.s32 1, %s2456_s17  ;;  %s27_s21 = sadd.s32 1, %s2460_s18  ;;  %s2464_s19 = sphi %s2499_s19, %s15_s19   ;;  %s2460_s18 = sphi %s2497_s18, %s3065_s18   ;;  %s2456_s17 = sphi %s2495_s17, %s3064_s17   ;;  %s2452_s16 = sphi %s2493_s16, %s3063_s16   ;;  %s2448_s15 = sphi %s2491_s15, %s3062_s15  }
   0x4   : > { %p25_p0 = scmp.ge.s32.totalorder %s24_s20, 2  ;;  %p1809_p1 = scmp.ge.s32.totalorder %s2464_s19, 1 }
   0x5   : > { %p185_p2 = scmp.lt.s32.totalorder %s2464_s19, 5 }
   0x6   : > { %s3067_s20 = smov (%p25_p0, %s24_s20), 0  ;;  %s3069_s21 = smov (!%p25_p0, %s27_s21), %s2460_s18 }
   0x7   : > { %p186_p3 = pnand %p1809_p1, %p185_p2  ;;  %p29_p4 = scmp.ge.s32.totalorder %s3069_s21, 2 }
   0x8   : > { %v2354_v0 = vld [vmem:[%s3058_s1 + $0x40] sm:$0xff] (!%p186_p3)   ;;  %v2358_v4 = vld [vmem:[%s3058_s1 + $0x48] sm:$0xff] (!%p186_p3)   ;;  %v2362_v8 = vld [vmem:[%s3058_s1 + $0x50] sm:$0xff] (!%p186_p3)   ;;  %p230_p5 = scmp.lt.s32.totalorder (!%p186_p3), %s2452_s16, 1  ;;  %s1818_s11 = smul.u32 (!%p186_p3), 192, %s2448_s15 }
   0x9   : > { %s3071_s21 = smov (%p29_p4, %s3069_s21), 0  ;;  %189 = sbr.rel (%p186_p3) target bundleno = 434 (0x1b2), region = 28 }
   0xa   : > { %v2355_v1 = vld [vmem:[%s3058_s1 + $0xc0] sm:$0xff] (!%p186_p3)   ;;  %1993 = vmatprep.subr.bf16.mxu0 (!%p186_p3), %v2354_v0  ;;  %v2359_v5 = vld [vmem:[%s3058_s1 + $0xc8] sm:$0xff] (!%p186_p3)   ;;  %v2363_v9 = vld [vmem:[%s3058_s1 + $0xd0] sm:$0xff] (!%p186_p3)   ;;  %p248_p7 = scmp.lt.s32.totalorder (!%p186_p3), %s2448_s15, 1 }
   0xb   : > { %v2356_v2 = vld [vmem:[%s3058_s1] sm:$0xff] (!%p186_p3)   ;;  %2057 = vmatprep.subr.bf16.mxu1 (!%p186_p3), %v2355_v1  ;;  %v2360_v6 = vld [vmem:[%s3058_s1 + $0x8] sm:$0xff] (!%p186_p3)   ;;  %v2364_v10 = vld [vmem:[%s3058_s1 + $0x10] sm:$0xff] (!%p186_p3)  }
   0xc   : > { %v2357_v3 = vld [vmem:[%s3058_s1 + $0x80] sm:$0xff] (!%p186_p3)   ;;  %1994 = vmatpush3.bf16.msra.mxu0 (!%p186_p3), %v2356_v2  ;;  %v2361_v7 = vld [vmem:[%s3058_s1 + $0x88] sm:$0xff] (!%p186_p3)   ;;  %v2365_v11 = vld [vmem:[%s3058_s1 + $0x90] sm:$0xff] (!%p186_p3)  }
   0xd   : > { %2058 = vmatpush3.bf16.msra.mxu1 (!%p186_p3), %v2357_v3  ;;  %1995 = vmatprep.subr.bf16.mxu0 (!%p186_p3), %v2358_v4  ;;  %v2366_v12 = vld [vmem:[%s3058_s1 + $0x58] sm:$0xff] (!%p186_p3)   ;;  %v2370_v16 = vld [vmem:[%s3058_s1 + $0x60] sm:$0xff] (!%p186_p3)   ;;  %v2374_v20 = vld [vmem:[%s3058_s1 + $0x68] sm:$0xff] (!%p186_p3)  }
   0xe   : > { %2059 = vmatprep.subr.bf16.mxu1 (!%p186_p3), %v2359_v5  ;;  %v2367_v13 = vld [vmem:[%s3058_s1 + $0xd8] sm:$0xff] (!%p186_p3)   ;;  %v2371_v17 = vld [vmem:[%s3058_s1 + $0xe0] sm:$0xff] (!%p186_p3)   ;;  %v2375_v21 = vld [vmem:[%s3058_s1 + $0xe8] sm:$0xff] (!%p186_p3)  }
   0xf   : > { %v2368_v14 = vld [vmem:[%s3058_s1 + $0x18] sm:$0xff] (!%p186_p3)   ;;  %v2372_v18 = vld [vmem:[%s3058_s1 + $0x20] sm:$0xff] (!%p186_p3)   ;;  %v2376_v22 = vld [vmem:[%s3058_s1 + $0x28] sm:$0xff] (!%p186_p3)  }
  0x10   : > { %1996 = vmatpush3.bf16.msra.mxu0 %v2360_v6  ;;  %v2369_v15 = vld [vmem:[%s3058_s1 + $0x98] sm:$0xff]   ;;  %s3073_s16 = smov (!%p230_p5, %s2452_s16), 1  ;;  %v2373_v19 = vld [vmem:[%s3058_s1 + $0xa0] sm:$0xff]   ;;  %v2377_v23 = vld [vmem:[%s3058_s1 + $0xa8] sm:$0xff]  }
  0x11   : > { %2060 = vmatpush3.bf16.msra.mxu1 %v2361_v7  ;;  %1997 = vmatprep.subr.bf16.mxu0 %v2362_v8  ;;  %s2313_s30 = smul.u32 432, %s3073_s16  ;;  %v2378_v24 = vld [vmem:[%s3058_s1 + $0x70] sm:$0xff]   ;;  %v2382_v28 = vld [vmem:[%s3058_s1 + $0x78] sm:$0xff]   ;;  %v2386_v44 = vld [vmem:[%s3058_s1 + $0x140] sm:$0xff]   ;;  %s1813_s25 = sshll.u32 %s3073_s16, 5 }
  0x12   : > { %2061 = vmatprep.subr.bf16.mxu1 %v2363_v9  ;;  %v2379_v25 = vld [vmem:[%s3058_s1 + $0xf0] sm:$0xff]   ;;  %v2383_v29 = vld [vmem:[%s3058_s1 + $0xf8] sm:$0xff]   ;;  %v2387_v45 = vld [vmem:[%s3058_s1 + $0x100] sm:$0xff]   ;;  %s1815_s6 = sshll.u32 %s3073_s16, 1 }
  0x13   : > { %v2380_v26 = vld [vmem:[%s3058_s1 + $0x30] sm:$0xff]   ;;  %s234_s23 = scalar_lea.vmem %s3057_s0, %s2313_s30  ;;  %v2384_v30 = vld [vmem:[%s3058_s1 + $0x38] sm:$0xff]   ;;  %v2388_v54 = vld [vmem:[%s3058_s1 + $0x148] sm:$0xff]  }
  0x14   : > { %1998 = vmatpush3.bf16.msra.mxu0 %v2364_v10  ;;  %v2381_v27 = vld [vmem:[%s3058_s1 + $0xb0] sm:$0xff]   ;;  %s2624_s5 = scalar_lea.vmem %s234_s23, %s1818_s11  ;;  %v2385_v31 = vld [vmem:[%s3058_s1 + $0xb8] sm:$0xff]   ;;  %v2389_v55 = vld [vmem:[%s3058_s1 + $0x108] sm:$0xff]  }
  0x15   : > { %2062 = vmatpush3.bf16.msra.mxu1 %v2365_v11  ;;  %1999 = vmatprep.subr.bf16.mxu0 %v2366_v12  ;;  %v288_v32 = vld [vmem:[%s2624_s5 + $0x1] sm:$0xff]  ;;  %v289_v33 = vld [vmem:[%s2624_s5 + $0x9] sm:$0xff]  ;;  %v1821_v34 = vld [vmem:[%s2624_s5 + $0x18] sm:$0xff] }
  0x16   : > { %2063 = vmatprep.subr.bf16.mxu1 %v2367_v13  ;;  %v304_v35 = vpack.c.bf16 %v289_v33, %v288_v32  ;;  %v1822_v36 = vld [vmem:[%s2624_s5 + $0x20] sm:$0xff]  ;;  %v265_v38 = vld [vmem:[%s2624_s5 + $0x8] sm:$0xff]  ;;  %v1823_v48 = vld [vmem:[%s2624_s5 + $0x30] sm:$0xff] }
  0x17   : > { %v264_v37 = vld [vmem:[%s2624_s5] sm:$0xff]  ;;  %v355_v39 = vpack.c.bf16 %v1822_v36, %v1821_v34  ;;  %v313_v42 = vld [vmem:[%s2624_s5 + $0xa] sm:$0xff]  ;;  %v1824_v49 = vld [vmem:[%s2624_s5 + $0x38] sm:$0xff] }
  0x18   : > { %2000 = vmatpush3.bf16.msra.mxu0 %v2368_v14  ;;  %v280_v40 = vpack.c.bf16 %v265_v38, %v264_v37  ;;  %v312_v41 = vld [vmem:[%s2624_s5 + $0x2] sm:$0xff]  ;;  %1094 = vmatprep.mubr.bf16.mxu0 %v304_v35  ;;  %v290_v46 = vld [vmem:[%s2624_s5 + $0x19] sm:$0xff]  ;;  %v2652_v51 = vpack.c.bf16 %v1824_v49, %v1823_v48  ;;  %v292_v56 = vld [vmem:[%s2624_s5 + $0x31] sm:$0xff] }
  0x19   : > { %2064 = vmatpush3.bf16.msra.mxu1 %v2369_v15  ;;  %2001 = vmatprep.subr.bf16.mxu0 %v2370_v16  ;;  %v328_v43 = vpack.c.bf16 %v313_v42, %v312_v41  ;;  %v291_v47 = vld [vmem:[%s2624_s5 + $0x21] sm:$0xff]  ;;  %v293_v58 = vld [vmem:[%s2624_s5 + $0x39] sm:$0xff]  ;;  %v1826_v60 = vld [vmem:[%s2624_s5 + $0x50] sm:$0xff] }
  0x1a   : > { %2065 = vmatprep.subr.bf16.mxu1 %v2371_v17  ;;  %1191 = vmatprep.mubr.bf16.mxu1 %v355_v39  ;;  %v2650_v50 = vpack.c.bf16 %v291_v47, %v290_v46  ;;  %v314_v52 = vld [vmem:[%s2624_s5 + $0x1a] sm:$0xff]  ;;  %v315_v53 = vld [vmem:[%s2624_s5 + $0x22] sm:$0xff]  ;;  %v2670_v61 = vpack.c.bf16 %v293_v58, %v292_v56  ;;  %v2390_v63 = vld [vmem:[%s3058_s1 + $0x150] sm:$0xff]  }
  0x1b   : > { %v2665_v57 = vpack.c.bf16 %v315_v53, %v314_v52  ;;  %v1825_v59 = vld [vmem:[%s2624_s5 + $0x48] sm:$0xff]  ;;  %v316_v0 = vld [vmem:[%s2624_s5 + $0x32] sm:$0xff]  ;;  %v317_v1 = vld [vmem:[%s2624_s5 + $0x3a] sm:$0xff] }
  0x1c   : > { %2002 = vmatpush3.bf16.msra.mxu0 %v2372_v18  ;;  %v2672_v62 = vpack.c.bf16 %v1826_v60, %v1825_v59  ;;  %v2391_v2 = vld [vmem:[%s3058_s1 + $0x1c0] sm:$0xff]   ;;  %v2392_v3 = vld [vmem:[%s3058_s1 + $0x110] sm:$0xff]   ;;  %v1828_v8 = vld [vmem:[%s2624_s5 + $0x68] sm:$0xff]  ;;  %v2695_v9 = vpack.c.bf16 %v317_v1, %v316_v0 }
  0x1d   : > { %2066 = vmatpush3.bf16.msra.mxu1 %v2373_v19  ;;  %2003 = vmatprep.subr.bf16.mxu0 %v2374_v20  ;;  %v2393_v4 = vld [vmem:[%s3058_s1 + $0x180] sm:$0xff]   ;;  %v294_v5 = vld [vmem:[%s2624_s5 + $0x49] sm:$0xff]  ;;  %v295_v6 = vld [vmem:[%s2624_s5 + $0x51] sm:$0xff] }
  0x1e   : > { %2067 = vmatprep.subr.bf16.mxu1 %v2375_v21  ;;  %v1827_v7 = vld [vmem:[%s2624_s5 + $0x60] sm:$0xff]  ;;  %v2697_v10 = vpack.c.bf16 %v295_v6, %v294_v5  ;;  %v2394_v11 = vld [vmem:[%s3058_s1 + $0x158] sm:$0xff]   ;;  %v2395_v13 = vld [vmem:[%s3058_s1 + $0x1c8] sm:$0xff]  }
  0x1f   : > { %v2702_v12 = vpack.c.bf16 %v1828_v8, %v1827_v7  ;;  %v2396_v14 = vld [vmem:[%s3058_s1 + $0x118] sm:$0xff]   ;;  %v318_v15 = vld [vmem:[%s2624_s5 + $0x4a] sm:$0xff]  ;;  %v296_v18 = vld [vmem:[%s2624_s5 + $0x61] sm:$0xff] }
  0x20   : > { %2004 = vmatpush3.bf16.msra.mxu0 %v2376_v22  ;;  %v2397_v16 = vld [vmem:[%s3058_s1 + $0x188] sm:$0xff]   ;;  %v319_v17 = vld [vmem:[%s2624_s5 + $0x52] sm:$0xff]  ;;  %v1830_v21 = vld [vmem:[%s2624_s5 + $0x80] sm:$0xff] }
  0x21   : > { %2068 = vmatpush3.bf16.msra.mxu1 %v2377_v23  ;;  %2005 = vmatprep.subr.bf16.mxu0 %v2378_v24  ;;  %v297_v19 = vld [vmem:[%s2624_s5 + $0x69] sm:$0xff]  ;;  %v1829_v20 = vld [vmem:[%s2624_s5 + $0x78] sm:$0xff]  ;;  %v2398_v22 = vld [vmem:[%s3058_s1 + $0x160] sm:$0xff]   ;;  %v2729_v24 = vpack.c.bf16 %v319_v17, %v318_v15 }
  0x22   : > { %2069 = vmatprep.subr.bf16.mxu1 %v2379_v25  ;;  %v2399_v23 = vld [vmem:[%s3058_s1 + $0x1d0] sm:$0xff]   ;;  %v2731_v25 = vpack.c.bf16 %v297_v19, %v296_v18  ;;  %v299_v32 = vld [vmem:[%s2624_s5 + $0x81] sm:$0xff]  ;;  %v1832_v34 = vld [vmem:[%s2624_s5 + $0x98] sm:$0xff] }
  0x23   : > { %v1831_v33 = vld [vmem:[%s2624_s5 + $0x90] sm:$0xff]  ;;  %v2402_v35 = vld [vmem:[%s3058_s1 + $0x168] sm:$0xff]   ;;  %v2403_v36 = vld [vmem:[%s3058_s1 + $0x1d8] sm:$0xff]  }
  0x24   : > { %2006 = vmatpush3.bf16.msra.mxu0 %v2380_v26  ;;  %v2400_v26 = vld [vmem:[%s3058_s1 + $0x120] sm:$0xff]   ;;  %v2404_v37 = vld [vmem:[%s3058_s1 + $0x128] sm:$0xff]   ;;  %v2405_v38 = vld [vmem:[%s3058_s1 + $0x198] sm:$0xff]   ;;  %v2767_v41 = vpack.c.bf16 %v1832_v34, %v1831_v33 }
  0x25   : > { %2070 = vmatpush3.bf16.msra.mxu1 %v2381_v27  ;;  %2007 = vmatprep.subr.bf16.mxu0 %v2382_v28  ;;  %v2736_v27 = vpack.c.bf16 %v1830_v21, %v1829_v20  ;;  %v2401_v28 = vld [vmem:[%s3058_s1 + $0x190] sm:$0xff]   ;;  %v301_v46 = vld [vmem:[%s2624_s5 + $0x99] sm:$0xff]  ;;  %v1833_v48 = vld [vmem:[%s2624_s5 + $0xa8] sm:$0xff] }
  0x26   : > { %2071 = vmatprep.subr.bf16.mxu1 %v2383_v29  ;;  %v320_v29 = vld [vmem:[%s2624_s5 + $0x62] sm:$0xff]  ;;  %v2406_v42 = vld [vmem:[%s3058_s1 + $0x170] sm:$0xff]   ;;  %v2412_v60 = vld [vmem:[%s3058_s1 + $0x178] sm:$0xff]  }
  0x27   : > { %v2407_v47 = vld [vmem:[%s3058_s1 + $0x1e0] sm:$0xff]   ;;  %v1834_v49 = vld [vmem:[%s2624_s5 + $0xb0] sm:$0xff]  ;;  %v1836_v5 = vld [vmem:[%s2624_s5 + $0xc8] sm:$0xff] }
  0x28   : > { %2008 = vmatpush3.bf16.msra.mxu0 %v2384_v30  ;;  %v321_v30 = vld [vmem:[%s2624_s5 + $0x6a] sm:$0xff]  ;;  %v2409_v53 = vld [vmem:[%s3058_s1 + $0x1a0] sm:$0xff]   ;;  %v2801_v59 = vpack.c.bf16 %v1834_v49, %v1833_v48  ;;  %v2414_v6 = vld [vmem:[%s3058_s1 + $0x138] sm:$0xff]  }
  0x29   : > { %2072 = vmatpush3.bf16.msra.mxu1 %v2385_v31  ;;  %2121 = vmatprep.subr.bf16.mxu0 %v2386_v44  ;;  %v298_v31 = vld [vmem:[%s2624_s5 + $0x79] sm:$0xff]  ;;  %v323_v44 = vld [vmem:[%s2624_s5 + $0x82] sm:$0xff]  ;;  %v2408_v52 = vld [vmem:[%s3058_s1 + $0x130] sm:$0xff]  }
  0x2a   : > { %2185 = vmatprep.subr.bf16.mxu1 %v2391_v2  ;;  %v325_v0 = vld [vmem:[%s2624_s5 + $0x9a] sm:$0xff]  ;;  %v302_v1 = vld [vmem:[%s2624_s5 + $0xa9] sm:$0xff]  ;;  %v303_v2 = vld [vmem:[%s2624_s5 + $0xb1] sm:$0xff] }
  0x2b   : > { %1095 = vmatmul.mubr.bf16.vlgmr.msra.gmra.mrb[0].mxu0 %v280_v40  ;;  %v2765_v40 = vpack.c.bf16 %v299_v32, %v298_v31  ;;  %v2415_v7 = vld [vmem:[%s3058_s1 + $0x1b0] sm:$0xff]   ;;  %v2416_v8 = vld [vmem:[%s3058_s1 + $0x1f8] sm:$0xff]   ;;  %v2418_v15 = vld [vmem:[%s3058_s1 + $0x200] sm:$0xff]  }
  0x2c   : > { %1192 = vmatmul.mubr.bf16.vlgmr.msra.gmra.mrb[0].mxu1 %v328_v43  ;;  %2122 = vmatpush3.bf16.msra.mxu0 %v2387_v45  ;;  %v322_v43 = vld [vmem:[%s2624_s5 + $0x7a] sm:$0xff]  ;;  %v300_v45 = vld [vmem:[%s2624_s5 + $0x91] sm:$0xff]  ;;  %v2419_v20 = vld [vmem:[%s3058_s1 + $0x208] sm:$0xff]  }
  0x2d   : > { %1102 = vmatprep.mubr.bf16.mxu0 %v2650_v50  ;;  %1199 = vmatprep.mubr.bf16.mxu1 %v2652_v51  ;;  %v2797_v56 = vpack.c.bf16 %v323_v44, %v322_v43  ;;  %v2799_v58 = vpack.c.bf16 %v301_v46, %v300_v45  ;;  %v326_v17 = vld [vmem:[%s2624_s5 + $0xaa] sm:$0xff]  ;;  %v327_v18 = vld [vmem:[%s2624_s5 + $0xb2] sm:$0xff]  ;;  %v1886_v31 = vld [vmem:[%s2624_s5 + $0xe0] sm:$0xff] }
  0x2e   : > { %2123 = vmatprep.subr.bf16.mxu0 %v2388_v54  ;;  %2186 = vmatpush3.bf16.msra.mxu1 %v2393_v4  ;;  %v2410_v54 = vld [vmem:[%s3058_s1 + $0x1e8] sm:$0xff]   ;;  %v1835_v4 = vld [vmem:[%s2624_s5 + $0xc0] sm:$0xff]  ;;  %v2846_v19 = vpack.c.bf16 %v327_v18, %v326_v17  ;;  %v2420_v21 = vld [vmem:[%s3058_s1 + $0x210] sm:$0xff]  }
  0x2f   : > { %2187 = vmatprep.subr.bf16.mxu1 %v2395_v13  ;;  %v1917_v33 = vld [vmem:[%s2624_s5 + $0xda] sm:$0xff]  ;;  %v1918_v34 = vld [vmem:[%s2624_s5 + $0xe2] sm:$0xff] }
  0x30   : > { %2124 = vmatpush3.bf16.msra.mxu0 %v2389_v55  ;;  %v2411_v55 = vld [vmem:[%s3058_s1 + $0x1a8] sm:$0xff]  }
  0x31   : > { %2125 = vmatprep.subr.bf16.mxu0 %v2390_v63  ;;  %v324_v63 = vld [vmem:[%s2624_s5 + $0x92] sm:$0xff] }
  0x32   : > { %2188 = vmatpush3.bf16.msra.mxu1 %v2397_v16  ;;  %v2831_v13 = vpack.c.bf16 %v325_v0, %v324_v63  ;;  %v2838_v16 = vpack.c.bf16 %v1836_v5, %v1835_v4 }
  0x33   : > { %1103 = vmatmul.mubr.bf16.gmra.mrb[4].mxu0 %v355_v39  ;;  %2189 = vmatprep.subr.bf16.mxu1 %v2399_v23  ;;  %v2763_v39 = vpack.c.bf16 %v321_v30, %v320_v29  ;;  %v1867_v23 = vld [vmem:[%s2624_s5 + $0xc2] sm:$0xff]  ;;  %v1885_v30 = vld [vmem:[%s2624_s5 + $0xd8] sm:$0xff] }
  0x34   : > { %1200 = vmatmul.mubr.bf16.gmra.mrb[4].mxu1 %v2665_v57  ;;  %1110 = vmatprep.mubr.bf16.mxu0 %v2670_v61  ;;  %v437_v32 = vpack.c.bf16 %v1886_v31, %v1885_v30 }
  0x35   : > { %1207 = vmatprep.mubr.bf16.mxu1 %v2672_v62  ;;  %2126 = vmatpush3.bf16.msra.mxu0 %v2392_v3  ;;  %v2413_v3 = vld [vmem:[%s3058_s1 + $0x1f0] sm:$0xff]  }
  0x36   : > { %2127 = vmatprep.subr.bf16.mxu0 %v2394_v11  ;;  %2190 = vmatpush3.bf16.msra.mxu1 %v2401_v28  ;;  %v2417_v11 = vld [vmem:[%s3058_s1 + $0x1b8] sm:$0xff]  }
  0x37   : > { %2191 = vmatprep.subr.bf16.mxu1 %v2403_v36 }
  0x39   : > { %2128 = vmatpush3.bf16.msra.mxu0 %v2396_v14  ;;  %v2833_v14 = vpack.c.bf16 %v303_v2, %v302_v1 }
  0x3a   : > { %2129 = vmatprep.subr.bf16.mxu0 %v2398_v22  ;;  %2192 = vmatpush3.bf16.msra.mxu1 %v2405_v38 }
  0x3b   : > { %1111 = vmatmul.mubr.bf16.gmra.mrb[8].mxu0 %v2652_v51  ;;  %2193 = vmatprep.subr.bf16.mxu1 %v2407_v47 }
  0x3c   : > { %1208 = vmatmul.mubr.bf16.gmra.mrb[8].mxu1 %v2695_v9  ;;  %1118 = vmatprep.mubr.bf16.mxu0 %v2697_v10 }
  0x3d   : > { %1215 = vmatprep.mubr.bf16.mxu1 %v2702_v12  ;;  %2130 = vmatpush3.bf16.msra.mxu0 %v2400_v26  ;;  %v1901_v26 = vld [vmem:[%s2624_s5 + $0xd9] sm:$0xff] }
  0x3e   : > { %2131 = vmatprep.subr.bf16.mxu0 %v2402_v35  ;;  %2194 = vmatpush3.bf16.msra.mxu1 %v2409_v53  ;;  %v485_v35 = vpack.c.bf16 %v1918_v34, %v1917_v33 }
  0x3f   : > { %2195 = vmatprep.subr.bf16.mxu1 %v2410_v54 }
  0x41   : > { %2132 = vmatpush3.bf16.msra.mxu0 %v2404_v37 }
  0x42   : > { %2133 = vmatprep.subr.bf16.mxu0 %v2406_v42  ;;  %2196 = vmatpush3.bf16.msra.mxu1 %v2411_v55 }
  0x43   : > { %1119 = vmatmul.mubr.bf16.gmra.mrb[12].mxu0 %v2672_v62  ;;  %2197 = vmatprep.subr.bf16.mxu1 %v2413_v3 }
  0x44   : > { %1216 = vmatmul.mubr.bf16.gmra.mrb[12].mxu1 %v2729_v24  ;;  %1126 = vmatprep.mubr.bf16.mxu0 %v2731_v25 }
  0x45   : > { %1223 = vmatprep.mubr.bf16.mxu1 %v2736_v27  ;;  %2134 = vmatpush3.bf16.msra.mxu0 %v2408_v52 }
  0x46   : > { %2135 = vmatprep.subr.bf16.mxu0 %v2412_v60  ;;  %2198 = vmatpush3.bf16.msra.mxu1 %v2415_v7 }
  0x47   : > { %2199 = vmatprep.subr.bf16.mxu1 %v2416_v8 }
  0x49   : > { %2136 = vmatpush3.bf16.msra.mxu0 %v2414_v6 }
  0x4a   : > { %2265 = vmatprep.subr.bf16.mxu0 %v2418_v15  ;;  %2200 = vmatpush3.bf16.msra.mxu1 %v2417_v11 }
  0x4b   : > { %1127 = vmatmul.mubr.bf16.gmra.mrb[16].mxu0 %v2702_v12  ;;  %2297 = vmatprep.subr.bf16.mxu1 %v2418_v15 }
  0x4c   : > { %1224 = vmatmul.mubr.bf16.gmra.mrb[16].mxu1 %v2763_v39  ;;  %1134 = vmatprep.mubr.bf16.mxu0 %v2765_v40 }
  0x4d   : > { %1231 = vmatprep.mubr.bf16.mxu1 %v2767_v41 }
  0x53   : > { %1135 = vmatmul.mubr.bf16.gmra.mrb[20].mxu0 %v2736_v27 }
  0x54   : > { %1232 = vmatmul.mubr.bf16.gmra.mrb[20].mxu1 %v2797_v56  ;;  %1142 = vmatprep.mubr.bf16.mxu0 %v2799_v58 }
  0x55   : > { %1239 = vmatprep.mubr.bf16.mxu1 %v2801_v59 }
  0x5b   : > { %1143 = vmatmul.mubr.bf16.gmra.mrb[24].mxu0 %v2767_v41 }
  0x5c   : > { %1240 = vmatmul.mubr.bf16.gmra.mrb[24].mxu1 %v2831_v13  ;;  %1150 = vmatprep.mubr.bf16.mxu0 %v2833_v14 }
  0x5d   : > { %1247 = vmatprep.mubr.bf16.mxu1 %v2838_v16 }
  0x63   : > { %1151 = vmatmul.mubr.bf16.gmra.mrb[28].mxu0 %v2801_v59 }
  0x64   : > { %1248 = vmatmul.mubr.bf16.gmra.mrb[28].mxu1 %v2846_v19  ;;  %1288 = vmatprep.mubr.bf16.mxu0 %v2665_v57  ;;  %v2423_v57 = vld [vmem:[%s3058_s1 + $0x228] sm:$0xff]  }
  0x65   : > { %1385 = vmatprep.mubr.bf16.mxu1 %v2670_v61 }
  0x6b   : > { %1289 = vmatmul.mubr.bf16.vlgmr.msra.gmra.mrb[32].mxu0 %v2650_v50  ;;  %v2421_v50 = vld [vmem:[%s3058_s1 + $0x218] sm:$0xff]  }
  0x6c   : > { %1386 = vmatmul.mubr.bf16.vlgmr.msra.gmra.mrb[32].mxu1 %v2652_v51  ;;  %2266 = vmatpush3.bf16.msra.mxu0 %v2418_v15  ;;  %v2422_v51 = vld [vmem:[%s3058_s1 + $0x220] sm:$0xff]  }
  0x6d   : > { %1296 = vmatprep.mubr.bf16.mxu0 %v2695_v9  ;;  %1393 = vmatprep.mubr.bf16.mxu1 %v2697_v10 }
  0x6e   : > { %2267 = vmatprep.subr.bf16.mxu0 %v2419_v20  ;;  %2305 = vmatpush3.bf16.msra.mxu1 %v2418_v15 }
  0x6f   : > { %2298 = vmatprep.subr.bf16.mxu1 %v2419_v20 }
  0x70   : > { %2268 = vmatpush3.bf16.msra.mxu0 %v2419_v20 }
  0x71   : > { %2269 = vmatprep.subr.bf16.mxu0 %v2420_v21 }
  0x72   : > { %2306 = vmatpush3.bf16.msra.mxu1 %v2419_v20 }
  0x73   : > { %1297 = vmatmul.mubr.bf16.gmra.mrb[36].mxu0 %v2670_v61  ;;  %2299 = vmatprep.subr.bf16.mxu1 %v2420_v21  ;;  %v2424_v61 = vld [vmem:[%s3058_s1 + $0x230] sm:$0xff]  }
  0x74   : > { %1394 = vmatmul.mubr.bf16.gmra.mrb[36].mxu1 %v2672_v62  ;;  %1304 = vmatprep.mubr.bf16.mxu0 %v2729_v24  ;;  %v2425_v62 = vld [vmem:[%s3058_s1 + $0x238] sm:$0xff]  }
  0x75   : > { %1401 = vmatprep.mubr.bf16.mxu1 %v2731_v25  ;;  %2270 = vmatpush3.bf16.msra.mxu0 %v2420_v21 }
  0x76   : > { %2271 = vmatprep.subr.bf16.mxu0 %v2421_v50  ;;  %2307 = vmatpush3.bf16.msra.mxu1 %v2420_v21 }
  0x77   : > { %2300 = vmatprep.subr.bf16.mxu1 %v2421_v50 }
  0x79   : > { %2272 = vmatpush3.bf16.msra.mxu0 %v2421_v50 }
  0x7a   : > { %2273 = vmatprep.subr.bf16.mxu0 %v2422_v51  ;;  %2308 = vmatpush3.bf16.msra.mxu1 %v2421_v50 }
  0x7b   : > { %1305 = vmatmul.mubr.bf16.gmra.mrb[40].mxu0 %v2697_v10  ;;  %2301 = vmatprep.subr.bf16.mxu1 %v2422_v51  ;;  %v1899_v10 = vld [vmem:[%s2624_s5 + $0xc1] sm:$0xff] }
  0x7c   : > { %1402 = vmatmul.mubr.bf16.gmra.mrb[40].mxu1 %v2702_v12  ;;  %1312 = vmatprep.mubr.bf16.mxu0 %v2763_v39  ;;  %v1900_v12 = vld [vmem:[%s2624_s5 + $0xc9] sm:$0xff] }
  0x7d   : > { %1409 = vmatprep.mubr.bf16.mxu1 %v2765_v40  ;;  %2274 = vmatpush3.bf16.msra.mxu0 %v2422_v51  ;;  %v460_v22 = vpack.c.bf16 %v1900_v12, %v1899_v10 }
  0x7e   : > { %2275 = vmatprep.subr.bf16.mxu0 %v2423_v57  ;;  %2309 = vmatpush3.bf16.msra.mxu1 %v2422_v51 }
  0x7f   : > { %2302 = vmatprep.subr.bf16.mxu1 %v2423_v57 }
  0x81   : > { %2276 = vmatpush3.bf16.msra.mxu0 %v2423_v57 }
  0x82   : > { %2277 = vmatprep.subr.bf16.mxu0 %v2424_v61  ;;  %2310 = vmatpush3.bf16.msra.mxu1 %v2423_v57 }
  0x83   : > { %1313 = vmatmul.mubr.bf16.gmra.mrb[44].mxu0 %v2731_v25  ;;  %2303 = vmatprep.subr.bf16.mxu1 %v2424_v61  ;;  %v1868_v25 = vld [vmem:[%s2624_s5 + $0xca] sm:$0xff] }
  0x84   : > { %1410 = vmatmul.mubr.bf16.gmra.mrb[44].mxu1 %v2736_v27  ;;  %1320 = vmatprep.mubr.bf16.mxu0 %v2797_v56  ;;  %v1902_v27 = vld [vmem:[%s2624_s5 + $0xe1] sm:$0xff]  ;;  %v410_v28 = vpack.c.bf16 %v1868_v25, %v1867_v23  ;;  %s1811_s5 = sshll.u32 %s2448_s15, 3  ;;  %s3077_s15 = smov (!%p248_p7, %s2448_s15), 1 }
  0x85   : > { %1417 = vmatprep.mubr.bf16.mxu1 %v2799_v58  ;;  %2278 = vmatpush3.bf16.msra.mxu0 %v2424_v61  ;;  %v461_v29 = vpack.c.bf16 %v1902_v27, %v1901_v26  ;;  %p238_p6 = scmp.lt.s32.totalorder %s1811_s5, 15  ;;  %s251_s7 = sadd.s32 %s1815_s6, %s3077_s15 }
  0x86   : > { %2279 = vmatprep.subr.bf16.mxu0 %v2425_v62  ;;  %2311 = vmatpush3.bf16.msra.mxu1 %v2424_v61  ;;  %s252_s10 = scalar_lea.vmem %s3060_s3, %s251_s7  ;;  %s259_s13 = scalar_lea.vmem %s3061_s4, %s251_s7 }
  0x87   : > { %2304 = vmatprep.subr.bf16.mxu1 %v2425_v62  ;;  %s3075_s5 = smov (!%p238_p6, %s1811_s5), 15 }
  0x88   : > { %s1812_s24 = sshll.u32 %s3075_s5, 1 }
  0x89   : > { %2280 = vmatpush3.bf16.msra.mxu0 %v2425_v62  ;;  %s242_s26 = sadd.s32 %s1813_s25, %s1812_s24 }
  0x8a   : > { %2312 = vmatpush3.bf16.msra.mxu1 %v2425_v62  ;;  %s1814_s27 = sshll.u32 %s242_s26, 3 }
  0x8b   : > { %1321 = vmatmul.mubr.bf16.gmra.mrb[48].mxu0 %v2765_v40  ;;  %s2991_s30 = scalar_lea.vmem %s3059_s2, %s1814_s27 }
  0x8c   : > { %1418 = vmatmul.mubr.bf16.gmra.mrb[48].mxu1 %v2767_v41  ;;  %1328 = vmatprep.mubr.bf16.mxu0 %v2831_v13 }
  0x8d   : > { %1425 = vmatprep.mubr.bf16.mxu1 %v2833_v14 }
  0x93   : > { %1329 = vmatmul.mubr.bf16.gmra.mrb[52].mxu0 %v2799_v58 }
  0x94   : > { %1426 = vmatmul.mubr.bf16.gmra.mrb[52].mxu1 %v2801_v59  ;;  %1336 = vmatprep.mubr.bf16.mxu0 %v2846_v19 }
  0x95   : > { %1433 = vmatprep.mubr.bf16.mxu1 %v460_v22 }
  0x9b   : > { %1337 = vmatmul.mubr.bf16.gmra.mrb[56].mxu0 %v2833_v14 }
  0x9c   : > { %1434 = vmatmul.mubr.bf16.gmra.mrb[56].mxu1 %v2838_v16  ;;  %1344 = vmatprep.mubr.bf16.mxu0 %v410_v28 }
  0x9d   : > { %1441 = vmatprep.mubr.bf16.mxu1 %v461_v29 }
  0xa3   : > { %1345 = vmatmul.mubr.bf16.gmra.mrb[60].mxu0 %v460_v22 }
  0xa4   : > { %1442 = vmatmul.mubr.bf16.gmra.mrb[60].mxu1 %v437_v32  ;;  %2281 = vmatprep.mubr.bf16.mxu0 %v2695_v9 }
  0xa5   : > { %2289 = vmatprep.mubr.bf16.mxu1 %v2831_v13 }
  0xab   : > { %2282 = vmatmul.mubr.bf16.vlgmr.msra.gmra.mrb[64].mxu0 %v2729_v24 }
  0xac   : > { %2290 = vmatmul.mubr.bf16.vlgmr.msra.gmra.mrb[64].mxu1 %v2846_v19  ;;  %2285 = vmatprep.mubr.bf16.mxu0 %v2763_v39 }
  0xad   : > { %2293 = vmatprep.mubr.bf16.mxu1 %v410_v28 }
  0xb3   : > { %2286 = vmatmul.mubr.bf16.gmra.mrb[68].mxu0 %v2797_v56 }
  0xb4   : > { %2294 = vmatmul.mubr.bf16.gmra.mrb[68].mxu1 %v485_v35 }
  0xfe   : > { %v2009_v36 = vpop.f32.mrb[0].mxu0 }
  0xff   : > { %v2073_v37 = vpop.f32.mrb[0].mxu1  ;;  %v2010_v38 = vpop.f32.mrb[1].mxu0 }
 0x100   : > { %v2011_v40 = vadd.f32 %v2010_v38, %v2009_v36  ;;  %v2074_v9 = vpop.f32.mrb[1].mxu1  ;;  %v2012_v41 = vpop.f32.mrb[2].mxu0 }
 0x101   : > { %v2075_v42 = vadd.f32 %v2074_v9, %v2073_v37  ;;  %v2076_v43 = vpop.f32.mrb[2].mxu1  ;;  %v2013_v24 = vpop.f32.mrb[3].mxu0 }
 0x102   : > { %v2014_v44 = vadd.f32 %v2013_v24, %v2012_v41  ;;  %v2077_v45 = vpop.f32.mrb[3].mxu1 }
 0x103   : > { %v2914_v46 = vadd.f32 %v2075_v42, %v2011_v40  ;;  %v2078_v39 = vadd.f32 %v2077_v45, %v2076_v43 }
 0x105   : > { %v2916_v47 = vadd.f32 %v2078_v39, %v2014_v44 }
 0x106   : > { %v2015_v48 = vpop.f32.mrb[4].mxu0 }
 0x107   : > { %v2079_v49 = vpop.f32.mrb[4].mxu1  ;;  %v2016_v52 = vpop.f32.mrb[5].mxu0 }
 0x108   : > { %v2017_v53 = vadd.f32 %v2016_v52, %v2015_v48  ;;  %v2080_v54 = vpop.f32.mrb[5].mxu1  ;;  %v2018_v55 = vpop.f32.mrb[6].mxu0 }
 0x109   : > { %v2081_v56 = vadd.f32 %v2080_v54, %v2079_v49  ;;  %v2082_v58 = vpop.f32.mrb[6].mxu1  ;;  %v2019_v59 = vpop.f32.mrb[7].mxu0 }
 0x10a   : > { %v2020_v60 = vadd.f32 %v2019_v59, %v2018_v55  ;;  %v2083_v63 = vpop.f32.mrb[7].mxu1 }
 0x10b   : > { %v2918_v0 = vadd.f32 %v2081_v56, %v2017_v53  ;;  %v2084_v1 = vadd.f32 %v2083_v63, %v2082_v58 }
 0x10d   : > { %v2920_v2 = vadd.f32 %v2084_v1, %v2020_v60 }
 0x10e   : > { %v2021_v3 = vpop.f32.mrb[8].mxu0 }
 0x10f   : > { %v2085_v4 = vpop.f32.mrb[8].mxu1  ;;  %v2022_v5 = vpop.f32.mrb[9].mxu0 }
 0x110   : > { %v2023_v6 = vadd.f32 %v2022_v5, %v2021_v3  ;;  %v2086_v7 = vpop.f32.mrb[9].mxu1  ;;  %v2024_v8 = vpop.f32.mrb[10].mxu0 }
 0x111   : > { %v2087_v11 = vadd.f32 %v2086_v7, %v2085_v4  ;;  %v2088_v13 = vpop.f32.mrb[10].mxu1  ;;  %v2025_v14 = vpop.f32.mrb[11].mxu0 }
 0x112   : > { %v2026_v15 = vadd.f32 %v2025_v14, %v2024_v8  ;;  %v2089_v16 = vpop.f32.mrb[11].mxu1 }
 0x113   : > { %v2922_v17 = vadd.f32 %v2087_v11, %v2023_v6  ;;  %v2090_v18 = vadd.f32 %v2089_v16, %v2088_v13 }
 0x115   : > { %v2924_v19 = vadd.f32 %v2090_v18, %v2026_v15 }
 0x116   : > { %v2027_v20 = vpop.f32.mrb[12].mxu0 }
 0x117   : > { %v2091_v21 = vpop.f32.mrb[12].mxu1  ;;  %v2028_v50 = vpop.f32.mrb[13].mxu0 }
 0x118   : > { %v2029_v51 = vadd.f32 %v2028_v50, %v2027_v20  ;;  %v2092_v57 = vpop.f32.mrb[13].mxu1  ;;  %v2030_v61 = vpop.f32.mrb[14].mxu0 }
 0x119   : > { %v2093_v62 = vadd.f32 %v2092_v57, %v2091_v21  ;;  %v2094_v10 = vpop.f32.mrb[14].mxu1  ;;  %v2031_v12 = vpop.f32.mrb[15].mxu0 }
 0x11a   : > { %v2032_v22 = vadd.f32 %v2031_v12, %v2030_v61  ;;  %v2095_v23 = vpop.f32.mrb[15].mxu1 }
 0x11b   : > { %v2926_v25 = vadd.f32 %v2093_v62, %v2029_v51  ;;  %v2096_v26 = vadd.f32 %v2095_v23, %v2094_v10 }
 0x11d   : > { %v2928_v27 = vadd.f32 %v2096_v26, %v2032_v22 }
 0x11e   : > { %v2033_v28 = vpop.f32.mrb[16].mxu0 }
 0x11f   : > { %v2097_v29 = vpop.f32.mrb[16].mxu1  ;;  %v2034_v30 = vpop.f32.mrb[17].mxu0 }
 0x120   : > { %v2035_v31 = vadd.f32 %v2034_v30, %v2033_v28  ;;  %v2098_v32 = vpop.f32.mrb[17].mxu1  ;;  %v2036_v33 = vpop.f32.mrb[18].mxu0 }
 0x121   : > { %v2099_v34 = vadd.f32 %v2098_v32, %v2097_v29  ;;  %v2100_v35 = vpop.f32.mrb[18].mxu1  ;;  %v2037_v36 = vpop.f32.mrb[19].mxu0 }
 0x122   : > { %v2038_v37 = vadd.f32 %v2037_v36, %v2036_v33  ;;  %v2101_v38 = vpop.f32.mrb[19].mxu1 }
 0x123   : > { %v2930_v40 = vadd.f32 %v2099_v34, %v2035_v31  ;;  %v2102_v9 = vadd.f32 %v2101_v38, %v2100_v35 }
 0x125   : > { %v2932_v41 = vadd.f32 %v2102_v9, %v2038_v37 }
 0x126   : > { %v2039_v42 = vpop.f32.mrb[20].mxu0 }
 0x127   : > { %v2103_v43 = vpop.f32.mrb[20].mxu1  ;;  %v2040_v24 = vpop.f32.mrb[21].mxu0 }
 0x128   : > { %v2041_v44 = vadd.f32 %v2040_v24, %v2039_v42  ;;  %v2104_v45 = vpop.f32.mrb[21].mxu1  ;;  %v2042_v39 = vpop.f32.mrb[22].mxu0 }
 0x129   : > { %v2105_v48 = vadd.f32 %v2104_v45, %v2103_v43  ;;  %v2106_v49 = vpop.f32.mrb[22].mxu1  ;;  %v2043_v52 = vpop.f32.mrb[23].mxu0 }
 0x12a   : > { %v2044_v53 = vadd.f32 %v2043_v52, %v2042_v39  ;;  %v2107_v54 = vpop.f32.mrb[23].mxu1 }
 0x12b   : > { %v2934_v55 = vadd.f32 %v2105_v48, %v2041_v44  ;;  %v2108_v56 = vadd.f32 %v2107_v54, %v2106_v49 }
 0x12d   : > { %v2936_v58 = vadd.f32 %v2108_v56, %v2044_v53 }
 0x12e   : > { %v2045_v59 = vpop.f32.mrb[24].mxu0 }
 0x12f   : > { %v2109_v60 = vpop.f32.mrb[24].mxu1  ;;  %v2046_v63 = vpop.f32.mrb[25].mxu0 }
 0x130   : > { %v2047_v1 = vadd.f32 %v2046_v63, %v2045_v59  ;;  %v2110_v3 = vpop.f32.mrb[25].mxu1  ;;  %v2048_v4 = vpop.f32.mrb[26].mxu0 }
 0x131   : > { %v2111_v5 = vadd.f32 %v2110_v3, %v2109_v60  ;;  %v2112_v6 = vpop.f32.mrb[26].mxu1  ;;  %v2049_v7 = vpop.f32.mrb[27].mxu0 }
 0x132   : > { %v2050_v8 = vadd.f32 %v2049_v7, %v2048_v4  ;;  %v2113_v11 = vpop.f32.mrb[27].mxu1 }
 0x133   : > { %v2938_v13 = vadd.f32 %v2111_v5, %v2047_v1  ;;  %v2114_v14 = vadd.f32 %v2113_v11, %v2112_v6 }
 0x135   : > { %v2940_v15 = vadd.f32 %v2114_v14, %v2050_v8 }
 0x136   : > { %v2051_v16 = vpop.f32.mrb[28].mxu0 }
 0x137   : > { %v2115_v18 = vpop.f32.mrb[28].mxu1  ;;  %v2052_v20 = vpop.f32.mrb[29].mxu0 }
 0x138   : > { %v2053_v21 = vadd.f32 %v2052_v20, %v2051_v16  ;;  %v2116_v50 = vpop.f32.mrb[29].mxu1  ;;  %v2054_v51 = vpop.f32.mrb[30].mxu0 }
 0x139   : > { %v2117_v57 = vadd.f32 %v2116_v50, %v2115_v18  ;;  %v2118_v61 = vpop.f32.mrb[30].mxu1  ;;  %v2055_v62 = vpop.f32.mrb[31].mxu0 }
 0x13a   : > { %v2056_v10 = vadd.f32 %v2055_v62, %v2054_v51  ;;  %v2119_v12 = vpop.f32.mrb[31].mxu1 }
 0x13b   : > { %v2942_v22 = vadd.f32 %v2117_v57, %v2053_v21  ;;  %v2120_v23 = vadd.f32 %v2119_v12, %v2118_v61 }
 0x13d   : > { %v2944_v26 = vadd.f32 %v2120_v23, %v2056_v10 }
 0x13e   : > { %v2137_v28 = vpop.f32.mrb[32].mxu0 }
 0x13f   : > { %v2138_v29 = vpop.f32.mrb[33].mxu0  ;;  %v2201_v30 = vpop.f32.mrb[32].mxu1 }
 0x140   : > { %v2139_v31 = vadd.f32 %v2138_v29, %v2137_v28  ;;  %v2140_v32 = vpop.f32.mrb[34].mxu0  ;;  %v2202_v33 = vpop.f32.mrb[33].mxu1 }
 0x141   : > { %v2141_v34 = vpop.f32.mrb[35].mxu0  ;;  %v2203_v35 = vadd.f32 %v2202_v33, %v2201_v30  ;;  %v2204_v36 = vpop.f32.mrb[34].mxu1 }
 0x142   : > { %v1291_v37 = vadd.f32 %v2139_v31, %v2914_v46  ;;  %v2142_v38 = vadd.f32 %v2141_v34, %v2140_v32  ;;  %v2205_v9 = vpop.f32.mrb[35].mxu1 }
 0x143   : > { %v2206_v42 = vadd.f32 %v2205_v9, %v2204_v36 }
 0x144   : > { %v1294_v43 = vadd.f32 %v2142_v38, %v2916_v47  ;;  %v2948_v24 = vadd.f32 %v2203_v35, %v1291_v37 }
 0x146   : > { %v2143_v44 = vpop.f32.mrb[36].mxu0  ;;  %v2950_v45 = vadd.f32 %v2206_v42, %v1294_v43 }
 0x147   : > { %v2144_v39 = vpop.f32.mrb[37].mxu0  ;;  %v2207_v48 = vpop.f32.mrb[36].mxu1 }
 0x148   : > { %v2145_v49 = vadd.f32 %v2144_v39, %v2143_v44  ;;  %v2146_v52 = vpop.f32.mrb[38].mxu0  ;;  %v2208_v53 = vpop.f32.mrb[37].mxu1 }
 0x149   : > { %v2147_v54 = vpop.f32.mrb[39].mxu0  ;;  %v2209_v56 = vadd.f32 %v2208_v53, %v2207_v48  ;;  %v2210_v59 = vpop.f32.mrb[38].mxu1 }
 0x14a   : > { %v1299_v46 = vadd.f32 %v2145_v49, %v2918_v0  ;;  %v2148_v60 = vadd.f32 %v2147_v54, %v2146_v52  ;;  %v2211_v63 = vpop.f32.mrb[39].mxu1 }
 0x14b   : > { %v2212_v1 = vadd.f32 %v2211_v63, %v2210_v59 }
 0x14c   : > { %v1302_v47 = vadd.f32 %v2148_v60, %v2920_v2  ;;  %v2954_v3 = vadd.f32 %v2209_v56, %v1299_v46 }
 0x14e   : > { %v2149_v4 = vpop.f32.mrb[40].mxu0  ;;  %v2956_v5 = vadd.f32 %v2212_v1, %v1302_v47 }
 0x14f   : > { %v2150_v6 = vpop.f32.mrb[41].mxu0  ;;  %v2213_v7 = vpop.f32.mrb[40].mxu1 }
 0x150   : > { %v2151_v8 = vadd.f32 %v2150_v6, %v2149_v4  ;;  %v2152_v11 = vpop.f32.mrb[42].mxu0  ;;  %v2214_v14 = vpop.f32.mrb[41].mxu1 }
 0x151   : > { %v2153_v16 = vpop.f32.mrb[43].mxu0  ;;  %v2215_v18 = vadd.f32 %v2214_v14, %v2213_v7  ;;  %v2216_v20 = vpop.f32.mrb[42].mxu1 }
 0x152   : > { %v1307_v0 = vadd.f32 %v2151_v8, %v2922_v17  ;;  %v2154_v21 = vadd.f32 %v2153_v16, %v2152_v11  ;;  %v2217_v50 = vpop.f32.mrb[43].mxu1 }
 0x153   : > { %v2218_v51 = vadd.f32 %v2217_v50, %v2216_v20 }
 0x154   : > { %v1310_v2 = vadd.f32 %v2154_v21, %v2924_v19  ;;  %v2960_v57 = vadd.f32 %v2215_v18, %v1307_v0 }
 0x156   : > { %v2155_v61 = vpop.f32.mrb[44].mxu0  ;;  %v2962_v62 = vadd.f32 %v2218_v51, %v1310_v2 }
 0x157   : > { %v2156_v10 = vpop.f32.mrb[45].mxu0  ;;  %v2219_v12 = vpop.f32.mrb[44].mxu1 }
 0x158   : > { %v2157_v23 = vadd.f32 %v2156_v10, %v2155_v61  ;;  %v2158_v28 = vpop.f32.mrb[46].mxu0  ;;  %v2220_v29 = vpop.f32.mrb[45].mxu1 }
 0x159   : > { %v2159_v30 = vpop.f32.mrb[47].mxu0  ;;  %v2221_v31 = vadd.f32 %v2220_v29, %v2219_v12  ;;  %v2222_v32 = vpop.f32.mrb[46].mxu1 }
 0x15a   : > { %v1315_v17 = vadd.f32 %v2157_v23, %v2926_v25  ;;  %v2160_v33 = vadd.f32 %v2159_v30, %v2158_v28  ;;  %v2223_v34 = vpop.f32.mrb[47].mxu1 }
 0x15b   : > { %v2224_v35 = vadd.f32 %v2223_v34, %v2222_v32 }
 0x15c   : > { %v1318_v19 = vadd.f32 %v2160_v33, %v2928_v27  ;;  %v2966_v36 = vadd.f32 %v2221_v31, %v1315_v17 }
 0x15e   : > { %v2161_v37 = vpop.f32.mrb[48].mxu0  ;;  %v2968_v38 = vadd.f32 %v2224_v35, %v1318_v19 }
 0x15f   : > { %v2162_v9 = vpop.f32.mrb[49].mxu0  ;;  %v2225_v42 = vpop.f32.mrb[48].mxu1 }
 0x160   : > { %v2163_v43 = vadd.f32 %v2162_v9, %v2161_v37  ;;  %v2164_v44 = vpop.f32.mrb[50].mxu0  ;;  %v2226_v39 = vpop.f32.mrb[49].mxu1 }
 0x161   : > { %v2165_v48 = vpop.f32.mrb[51].mxu0  ;;  %v2227_v49 = vadd.f32 %v2226_v39, %v2225_v42  ;;  %v2228_v52 = vpop.f32.mrb[50].mxu1 }
 0x162   : > { %v1323_v25 = vadd.f32 %v2163_v43, %v2930_v40  ;;  %v2166_v53 = vadd.f32 %v2165_v48, %v2164_v44  ;;  %v2229_v54 = vpop.f32.mrb[51].mxu1 }
 0x163   : > { %v2230_v56 = vadd.f32 %v2229_v54, %v2228_v52 }
 0x164   : > { %v1326_v27 = vadd.f32 %v2166_v53, %v2932_v41  ;;  %v2972_v59 = vadd.f32 %v2227_v49, %v1323_v25 }
 0x166   : > { %v2167_v46 = vpop.f32.mrb[52].mxu0  ;;  %v2974_v60 = vadd.f32 %v2230_v56, %v1326_v27 }
 0x167   : > { %v2168_v63 = vpop.f32.mrb[53].mxu0  ;;  %v2231_v1 = vpop.f32.mrb[52].mxu1 }
 0x168   : > { %v2169_v47 = vadd.f32 %v2168_v63, %v2167_v46  ;;  %v2170_v4 = vpop.f32.mrb[54].mxu0  ;;  %v2232_v6 = vpop.f32.mrb[53].mxu1 }
 0x169   : > { %v2171_v7 = vpop.f32.mrb[55].mxu0  ;;  %v2233_v8 = vadd.f32 %v2232_v6, %v2231_v1  ;;  %v2234_v11 = vpop.f32.mrb[54].mxu1 }
 0x16a   : > { %v1331_v40 = vadd.f32 %v2169_v47, %v2934_v55  ;;  %v2172_v14 = vadd.f32 %v2171_v7, %v2170_v4  ;;  %v2235_v16 = vpop.f32.mrb[55].mxu1 }
 0x16b   : > { %v2236_v18 = vadd.f32 %v2235_v16, %v2234_v11 }
 0x16c   : > { %v1334_v41 = vadd.f32 %v2172_v14, %v2936_v58  ;;  %v1428_v20 = vadd.f32 %v2233_v8, %v1331_v40 }
 0x16e   : > { %v2173_v0 = vpop.f32.mrb[56].mxu0  ;;  %v1431_v21 = vadd.f32 %v2236_v18, %v1334_v41 }
 0x16f   : > { %v2174_v50 = vpop.f32.mrb[57].mxu0  ;;  %v2237_v51 = vpop.f32.mrb[56].mxu1 }
 0x170   : > { %v2175_v2 = vadd.f32 %v2174_v50, %v2173_v0  ;;  %v2176_v61 = vpop.f32.mrb[58].mxu0  ;;  %v2238_v10 = vpop.f32.mrb[57].mxu1 }
 0x171   : > { %v2177_v12 = vpop.f32.mrb[59].mxu0  ;;  %v2239_v23 = vadd.f32 %v2238_v10, %v2237_v51  ;;  %v2240_v28 = vpop.f32.mrb[58].mxu1 }
 0x172   : > { %v1339_v55 = vadd.f32 %v2175_v2, %v2938_v13  ;;  %v2178_v29 = vadd.f32 %v2177_v12, %v2176_v61  ;;  %v2241_v30 = vpop.f32.mrb[59].mxu1 }
 0x173   : > { %v2242_v31 = vadd.f32 %v2241_v30, %v2240_v28 }
 0x174   : > { %v1342_v58 = vadd.f32 %v2178_v29, %v2940_v15  ;;  %v2981_v32 = vadd.f32 %v2239_v23, %v1339_v55 }
 0x176   : > { %v2179_v17 = vpop.f32.mrb[60].mxu0  ;;  %v2984_v33 = vadd.f32 %v2242_v31, %v1342_v58 }
 0x177   : > { %v2180_v34 = vpop.f32.mrb[61].mxu0  ;;  %v2243_v35 = vpop.f32.mrb[60].mxu1 }
 0x178   : > { %v2181_v19 = vadd.f32 %v2180_v34, %v2179_v17  ;;  %v2182_v37 = vpop.f32.mrb[62].mxu0  ;;  %v2244_v9 = vpop.f32.mrb[61].mxu1 }
 0x179   : > { %v2183_v42 = vpop.f32.mrb[63].mxu0  ;;  %v2245_v13 = vadd.f32 %v2244_v9, %v2243_v35  ;;  %v2246_v43 = vpop.f32.mrb[62].mxu1 }
 0x17a   : > { %v1347_v44 = vadd.f32 %v2181_v19, %v2942_v22  ;;  %v2184_v39 = vadd.f32 %v2183_v42, %v2182_v37  ;;  %v2247_v15 = vpop.f32.mrb[63].mxu1 }
 0x17b   : > { %v2248_v48 = vadd.f32 %v2247_v15, %v2246_v43 }
 0x17c   : > { %v1350_v49 = vadd.f32 %v2184_v39, %v2944_v26  ;;  %v1444_v52 = vadd.f32 %v2245_v13, %v1347_v44 }
 0x17e   : > { %v2283_v25 = vpop.f32.mrb[64].mxu0  ;;  %v1447_v53 = vadd.f32 %v2248_v48, %v1350_v49 }
 0x17f   : > { %v1493_v54 = vadd.f32 %v2283_v25, %v2954_v3  ;;  %v2291_v22 = vpop.f32.mrb[64].mxu1  ;;  %v1484_v56 = vpop.f32.mrb[65].mxu0 }
 0x180   : > { %v2994_v27 = vadd.f32 %v2291_v22, %v1428_v20  ;;  %v1485_v26 = vadd.f32 %v1484_v56, %v2948_v24  ;;  %v1516_v46 = vpop.f32.mrb[65].mxu1  ;;  %v2284_v63 = vpop.f32.mrb[66].mxu0 }
 0x181   : > { %1549 = vst [vmem:[%s2991_s30 + $0x10] sm:$0xff] %v1493_v54  ;;  %v1517_v1 = vadd.f32 %v1516_v46, %v2972_v59  ;;  %v1496_v47 = vadd.f32 %v2284_v63, %v2956_v5  ;;  %v2292_v4 = vpop.f32.mrb[66].mxu1  ;;  %v1487_v3 = vpop.f32.mrb[67].mxu0  ;;  %v1587_v40 = vmul.f32 %v1493_v54, %v1493_v54 }
 0x182   : > { %1557 = vst [vmem:[%s2991_s30 + $0x50] sm:$0xff] %v2994_v27  ;;  %1547 = vst [vmem:[%s2991_s30] sm:$0xff] %v1485_v26  ;;  %v3003_v6 = vadd.f32 %v2292_v4, %v1431_v21  ;;  %v1488_v7 = vadd.f32 %v1487_v3, %v2950_v45  ;;  %v1519_v24 = vpop.f32.mrb[67].mxu1  ;;  %v1585_v11 = vmul.f32 %v1485_v26, %v1485_v26 }
 0x183   : > { %1555 = vst [vmem:[%s2991_s30 + $0x40] sm:$0xff] %v1517_v1  ;;  %1550 = vst [vmem:[%s2991_s30 + $0x18] sm:$0xff] %v1496_v47  ;;  %v1520_v8 = vadd.f32 %v1519_v24, %v2974_v60  ;;  %v1588_v41 = vmul.f32 %v1496_v47, %v1496_v47  ;;  %v1593_v13 = vmul.f32 %v1517_v1, %v1517_v1 }
 0x184   : > { %1558 = vst [vmem:[%s2991_s30 + $0x58] sm:$0xff] %v3003_v6  ;;  %1548 = vst [vmem:[%s2991_s30 + $0x8] sm:$0xff] %v1488_v7  ;;  %v1563_v5 = vadd.f32 %v1488_v7, %v1485_v26  ;;  %v1586_v59 = vmul.f32 %v1488_v7, %v1488_v7 }
 0x185   : > { %1556 = vst [vmem:[%s2991_s30 + $0x48] sm:$0xff] %v1520_v8  ;;  %v1594_v39 = vmul.f32 %v1520_v8, %v1520_v8 }
 0x186   : > { %v1564_v14 = vadd.f32 %v1563_v5, %v1493_v54  ;;  %v1601_v16 = vadd.f32 %v1586_v59, %v1585_v11  ;;  %v2287_v18 = vpop.f32.mrb[68].mxu0 }
 0x187   : > { %v1509_v45 = vadd.f32 %v2287_v18, %v2966_v36  ;;  %v2295_v20 = vpop.f32.mrb[68].mxu1  ;;  %v1500_v0 = vpop.f32.mrb[69].mxu0 }
 0x188   : > { %v1602_v60 = vadd.f32 %v1601_v16, %v1587_v40  ;;  %v1541_v21 = vadd.f32 %v2295_v20, %v1444_v52  ;;  %v1501_v50 = vadd.f32 %v1500_v0, %v2960_v57  ;;  %v1565_v51 = vadd.f32 %v1564_v14, %v1496_v47  ;;  %v1532_v2 = vpop.f32.mrb[69].mxu1  ;;  %v2288_v61 = vpop.f32.mrb[70].mxu0 }
 0x189   : > { %1553 = vst [vmem:[%s2991_s30 + $0x30] sm:$0xff] %v1509_v45  ;;  %v1533_v10 = vadd.f32 %v1532_v2, %v2981_v32  ;;  %v1512_v12 = vadd.f32 %v2288_v61, %v2968_v38  ;;  %v2296_v23 = vpop.f32.mrb[70].mxu1  ;;  %v1503_v36 = vpop.f32.mrb[71].mxu0  ;;  %v1591_v34 = vmul.f32 %v1509_v45, %v1509_v45  ;;  %v1596_v52 = vmul.f32 %v3003_v6, %v3003_v6 }
 0x18a   : > { %1561 = vst [vmem:[%s2991_s30 + $0x70] sm:$0xff] %v1541_v21  ;;  %1551 = vst [vmem:[%s2991_s30 + $0x20] sm:$0xff] %v1501_v50  ;;  %v1566_v28 = vadd.f32 %v1565_v51, %v1501_v50  ;;  %v1589_v55 = vmul.f32 %v1501_v50, %v1501_v50  ;;  %v1603_v29 = vadd.f32 %v1602_v60, %v1588_v41  ;;  %v1535_v57 = vpop.f32.mrb[71].mxu1 }
 0x18b   : > { %1559 = vst [vmem:[%s2991_s30 + $0x60] sm:$0xff] %v1533_v10  ;;  %1554 = vst [vmem:[%s2991_s30 + $0x38] sm:$0xff] %v1512_v12  ;;  %v1544_v30 = vadd.f32 %v2296_v23, %v1447_v53  ;;  %v1504_v31 = vadd.f32 %v1503_v36, %v2962_v62  ;;  %v1536_v32 = vadd.f32 %v1535_v57, %v2984_v33 }
 0x18c   : > { %v1604_v58 = vadd.f32 %v1603_v29, %v1589_v55  ;;  %v1592_v37 = vmul.f32 %v1512_v12, %v1512_v12  ;;  %v1595_v33 = vmul.f32 %v2994_v27, %v2994_v27  ;;  %v1597_v54 = vmul.f32 %v1533_v10, %v1533_v10 }
 0x18d   : > { %1562 = vst [vmem:[%s2991_s30 + $0x78] sm:$0xff] %v1544_v30  ;;  %1552 = vst [vmem:[%s2991_s30 + $0x28] sm:$0xff] %v1504_v31  ;;  %v1567_v38 = vadd.f32 %v1566_v28, %v1504_v31  ;;  %v1590_v17 = vmul.f32 %v1504_v31, %v1504_v31  ;;  %v1598_v46 = vmul.f32 %v1536_v32, %v1536_v32 }
 0x18e   : > { %1560 = vst [vmem:[%s2991_s30 + $0x68] sm:$0xff] %v1536_v32  ;;  %v1600_v3 = vmul.f32 %v1544_v30, %v1544_v30 }
 0x18f   : > { %v1568_v35 = vadd.f32 %v1567_v38, %v1509_v45  ;;  %v1605_v19 = vadd.f32 %v1604_v58, %v1590_v17 }
 0x191   : > { %v1569_v9 = vadd.f32 %v1568_v35, %v1512_v12  ;;  %v1606_v42 = vadd.f32 %v1605_v19, %v1591_v34 }
 0x193   : > { %v1570_v43 = vadd.f32 %v1569_v9, %v1517_v1  ;;  %v1607_v44 = vadd.f32 %v1606_v42, %v1592_v37  ;;  %v1599_v1 = vmul.f32 %v1541_v21, %v1541_v21 }
 0x195   : > { %v1608_v15 = vadd.f32 %v1607_v44, %v1593_v13  ;;  %v1571_v62 = vadd.f32 %v1570_v43, %v1520_v8 }
 0x197   : > { %v1572_v48 = vadd.f32 %v1571_v62, %v2994_v27  ;;  %v1609_v49 = vadd.f32 %v1608_v15, %v1594_v39 }
 0x199   : > { %v1573_v25 = vadd.f32 %v1572_v48, %v3003_v6  ;;  %v1610_v53 = vadd.f32 %v1609_v49, %v1595_v33 }
 0x19b   : > { %v1574_v22 = vadd.f32 %v1573_v25, %v1533_v10  ;;  %v1611_v56 = vadd.f32 %v1610_v53, %v1596_v52 }
 0x19d   : > { %v1575_v26 = vadd.f32 %v1574_v22, %v1536_v32  ;;  %v1612_v63 = vadd.f32 %v1611_v56, %v1597_v54 }
 0x19f   : > { %v1576_v47 = vadd.f32 %v1575_v26, %v1541_v21  ;;  %v1613_v4 = vadd.f32 %v1612_v63, %v1598_v46 }
 0x1a1   : > { %v1577_v27 = vadd.f32 %v1576_v47, %v1544_v30  ;;  %v1614_v7 = vadd.f32 %v1613_v4, %v1599_v1 }
 0x1a3   : > { %v1578_v24 = vrot.slane %v1577_v27, 4  ;;  %v1615_v8 = vadd.f32 %v1614_v7, %v1600_v3 }
 0x1a5   : > { %v1579_v6 = vadd.f32 %v1578_v24, %v1577_v27  ;;  %v1616_v11 = vrot.slane %v1615_v8, 4 }
 0x1a7   : > { %v1580_v5 = vrot.slane %v1579_v6, 2  ;;  %v1617_v59 = vadd.f32 %v1616_v11, %v1615_v8 }
 0x1a9   : > { %v1581_v40 = vadd.f32 %v1580_v5, %v1579_v6  ;;  %v1618_v14 = vrot.slane %v1617_v59, 2 }
 0x1ab   : > { %v1582_v16 = vrot.slane %v1581_v40, 1  ;;  %v1619_v18 = vadd.f32 %v1618_v14, %v1617_v59 }
 0x1ad   : > { %v1583_v41 = vadd.f32 %v1582_v16, %v1581_v40  ;;  %v1620_v45 = vrot.slane %v1619_v18, 1 }
 0x1af   : > { %1584 = vst [vmem:[%s252_s10] sm:$0x1] %v1583_v41  ;;  %v1621_v20 = vadd.f32 %v1620_v45, %v1619_v18 }
 0x1b1   : > { %1622 = vst [vmem:[%s259_s13] sm:$0x1] %v1621_v20 }
 0x1b2 PF: > { %s15_s19 = sadd.s32 1, %s2464_s19   ;;  %s3062_s15 = smov %s2456_s17 }
 0x1b3   : > { %p12_p8 = scmp.ge.s32.totalorder %s15_s19, 6   ;;  %s3063_s16 = smov %s2460_s18 }
 0x1b4   : > { %s3064_s17 = smov %s3067_s20  ;;  %s3065_s18 = smov %s3071_s21 }
 0x1b5   :  { %14 = sbr.rel (!%p12_p8) target bundleno = 3 (0x3), region = 85 }

</bundles_post_ra>
